<compile_context>
chip_gen: v5e
topology: v5e:2x2
jax: 0.10.0
libtpu: 0.0.40
codegen_flags: <defaults>
</compile_context>

<pallas_src>
import jax
import jax.numpy as jnp
from jax.experimental import pallas as pl
from jax.experimental.pallas import tpu as pltpu

# Small, deterministic hyperparameters consistent with the module's forward.
VOCAB = 50
EMBED = 32
HIDDEN = 32      # 4*H = 128 -> each gate vector maps to exactly one lane extent
BATCH = 2
SEQ = 8
NUM_LAYERS = 2   # the two-layer wavefront is hard-coded in the kernel body


def lstm_kernel(tok_ref,      # SMEM [B, T] int32 token ids (scalar prefetch)
                g1tab_ref,    # VMEM [VOCAB, 1, 4H] f32: embedding @ W_ih1^T + b_ih1 + b_hh1
                w_ref,        # VMEM [3H, 4H] bf16: vstack(W_hh1^T, W_ih2^T, W_hh2^T)
                misc_ref,     # VMEM [2, 4H] f32: row0 = b2 (fused); row1 = [w_fc | b_fc | 0...]
                out_ref,      # VMEM [B, 1] f32
                g1_scr):      # VMEM scratch [T*B, 4H] f32: gathered layer-1 gate inputs
    H, B, T = HIDDEN, BATCH, SEQ

    # ---- 1) fused embedding + input-projection gather (precomputed table rows).
    # These gathers are independent of the recurrence, so the scheduler hides them
    # behind the first waves; only row (t=0) gates the start.
    for t in range(T):
        for b in range(B):
            tok = tok_ref[b, t]                               # scalar read from SMEM
            g1_scr[pl.ds(t * B + b, 1), :] = g1tab_ref[tok]   # dynamic leading-dim gather [1,4H]

    # ---- 2) weight / bias slices (weights already bf16 -> zero in-kernel casts) ----
    whh1 = w_ref[0 * H:1 * H, :]          # [H, 4H]
    wih2 = w_ref[1 * H:2 * H, :]          # [H, 4H]
    whh2 = w_ref[2 * H:3 * H, :]          # [H, 4H]
    b2 = misc_ref[0:1, :]                 # [1, 4H]  (b_ih2 + b_hh2 fused)
    head = misc_ref[1:2, :]               # [1, 4H]
    wfc = head[:, 0:H]                    # [1, H]
    bfc = head[:, H:H + 1]                # [1, 1]

    def gates(g):
        # one sigmoid + one tanh pass over the full 128-lane gate tile; PyTorch order i,f,g,o
        sig = jax.nn.sigmoid(g)
        tnh = jnp.tanh(g)
        return (sig[:, 0 * H:1 * H], sig[:, 1 * H:2 * H],
                tnh[:, 2 * H:3 * H], sig[:, 3 * H:4 * H])

    def cell1(t, h, c):
        # layer-1 step t: input-side gates come straight from the precomputed gather
        g = g1_scr[pl.ds(t * B, B), :] + jnp.dot(
            h.astype(jnp.bfloat16), whh1, preferred_element_type=jnp.float32)
        i, f, gg, o = gates(g)
        c_new = f * c + i * gg
        return o * jnp.tanh(c_new), c_new

    def cell2(h1_in, h, c):
        # layer-2 step: the h1_in @ W_ih2 term depends only on the previous wave's layer-1
        # output, so it is off the h2 recurrent critical path and overlaps with cell1.
        g = (b2
             + jnp.dot(h1_in.astype(jnp.bfloat16), wih2, preferred_element_type=jnp.float32)
             + jnp.dot(h.astype(jnp.bfloat16), whh2, preferred_element_type=jnp.float32))
        i, f, gg, o = gates(g)
        c_new = f * c + i * gg
        return o * jnp.tanh(c_new), c_new

    zeros = jnp.zeros((B, H), jnp.float32)

    # ---- 3) two-layer wavefront (fully unrolled, T=8 static): wave w runs layer-1 step w
    #         and layer-2 step w-1 as two independent chains whose latencies overlap ----
    h1, c1 = cell1(0, zeros, zeros)
    h2, c2 = zeros, zeros
    for w in range(1, T):
        h1_next, c1_next = cell1(w, h1, c1)      # layer-1 step w
        h2, c2 = cell2(h1, h2, c2)               # layer-2 step w-1 (consumes h1[w-1])
        h1, c1 = h1_next, c1_next
    h2, c2 = cell2(h1, h2, c2)                   # layer-2 step T-1
    # nn.LSTM inter-layer dropout and the module's nn.Dropout are identity in eval mode

    # ---- 4) fc + sigmoid head: VPU mul + lane reduction (no N=1 MXU matmul at the tail) ----
    logits = jnp.sum(h2 * wfc, axis=-1, keepdims=True) + bfc     # [B, 1]
    out_ref[...] = jax.nn.sigmoid(logits)


def init_params(key):
    """PyTorch-layout parameters (W_ih: [4H, in], W_hh: [4H, H], separate biases)."""
    ks = jax.random.split(key, 11)
    H, E = HIDDEN, EMBED
    scale = 0.1

    def rnd(k, shape):
        return (scale * jax.random.normal(k, shape)).astype(jnp.float32)

    return {
        "embedding": rnd(ks[0], (VOCAB, E)),
        "w_ih1": rnd(ks[1], (4 * H, E)),
        "w_hh1": rnd(ks[2], (4 * H, H)),
        "b_ih1": rnd(ks[3], (4 * H,)),
        "b_hh1": rnd(ks[4], (4 * H,)),
        "w_ih2": rnd(ks[5], (4 * H, H)),
        "w_hh2": rnd(ks[6], (4 * H, H)),
        "b_ih2": rnd(ks[7], (4 * H,)),
        "b_hh2": rnd(ks[8], (4 * H,)),
        "w_fc": rnd(ks[9], (1, H)),
        "b_fc": rnd(ks[10], (1,)),
    }


def pack_params(p):
    """Host-side, one-time: fold / pre-transpose / pre-cast params into 3 kernel operands."""
    H = HIDDEN
    # layer-1 input projection folded into the embedding table (f32, exact)
    g1_tab = p["embedding"] @ p["w_ih1"].T + p["b_ih1"] + p["b_hh1"]          # [VOCAB, 4H]
    g1_tab = g1_tab.reshape(VOCAB, 1, 4 * H).astype(jnp.float32)
    # recurrent / layer-2 weights: pre-transposed to right-multiply form, pre-cast to bf16
    w_slab = jnp.concatenate(
        [p["w_hh1"].T, p["w_ih2"].T, p["w_hh2"].T], axis=0).astype(jnp.bfloat16)  # [3H, 4H]
    # f32 misc slab: row0 = fused layer-2 bias, row1 = [w_fc | b_fc | zeros]
    misc = jnp.zeros((2, 4 * H), jnp.float32)
    misc = misc.at[0, :].set(p["b_ih2"] + p["b_hh2"])
    misc = misc.at[1, :H].set(p["w_fc"][0])
    misc = misc.at[1, H].set(p["b_fc"][0])
    return g1_tab, w_slab, misc


def text_lstm_forward(token_ids, g1_tab, w_slab, misc):
    vmem = pl.BlockSpec(memory_space=pltpu.MemorySpace.VMEM)
    tokens = jnp.clip(token_ids.astype(jnp.int32), 0, VOCAB - 1)   # guard OOB VMEM gather
    out = pl.pallas_call(
        lstm_kernel,
        out_shape=jax.ShapeDtypeStruct((BATCH, 1), jnp.float32),
        grid_spec=pltpu.PrefetchScalarGridSpec(
            num_scalar_prefetch=1,                 # token ids -> SMEM
            grid=(1,),
            in_specs=[vmem, vmem, vmem],           # 3 packed VMEM slabs (was 9 tensors)
            out_specs=vmem,
            scratch_shapes=[
                pltpu.VMEM((SEQ * BATCH, 4 * HIDDEN), jnp.float32),  # gathered g1 rows
            ]),
        compiler_params=pltpu.CompilerParams(dimension_semantics=("arbitrary",)),
    )(tokens, g1_tab, w_slab, misc)
    return out.squeeze()                           # matches torch x.squeeze() -> [B]
    # TODO(synk): at batch >> 2, pad B to a sublane multiple and add a leading "parallel"
    # batch grid axis so v7x's second TensorCore is used (pure overhead at B=2); if VOCAB
    # ever scales to a real vocabulary, move g1_tab to memory_space=pl.ANY with a manual
    # double-buffered make_async_copy gather keyed off the SMEM token ids.


if __name__ == "__main__":
    key = jax.random.PRNGKey(0)
    pkey, dkey = jax.random.split(key)
    params = init_params(pkey)
    g1_tab, w_slab, misc = pack_params(params)
    token_ids = jax.random.randint(dkey, (BATCH, SEQ), 0, VOCAB, dtype=jnp.int32)

    probs = jax.jit(text_lstm_forward)(token_ids, g1_tab, w_slab, misc)
    probs = jax.block_until_ready(probs)
    assert probs.shape == (BATCH,)
    assert bool(jnp.all((probs >= 0.0) & (probs <= 1.0)))
    print("KERNEL_OK")
</pallas_src>

<mosaic_0001>
module attributes {stable_mosaic.version = 11 : i64} {
  func.func @lstm_kernel(%arg0: i32, %arg1: memref<2x8xi32, #tpu.memory_space<smem>>, %arg2: memref<50x1x128xf32, #tpu.memory_space<vmem>>, %arg3: memref<96x128xbf16, #tpu.memory_space<vmem>>, %arg4: memref<2x128xf32, #tpu.memory_space<vmem>>, %arg5: memref<2x1xf32, #tpu.memory_space<vmem>>, %arg6: memref<16x128xf32, #tpu.memory_space<vmem>>) attributes {dimension_semantics = [#tpu.dimension_semantics<arbitrary>], iteration_bounds = array<i64: 1>, scalar_prefetch = 1 : i64, scratch_operands = 1 : i64, tpu.core_type = #tpu.core_type<tc>, window_params = [{pipeline_mode = #tpu.pipeline_mode<synchronous>, transform_indices = @transform_0, window_bounds = array<i64: 50, 1, 128>}, {pipeline_mode = #tpu.pipeline_mode<synchronous>, transform_indices = @transform_1, window_bounds = array<i64: 96, 128>}, {pipeline_mode = #tpu.pipeline_mode<synchronous>, transform_indices = @transform_2, window_bounds = array<i64: 2, 128>}, {pipeline_mode = #tpu.pipeline_mode<synchronous>, transform_indices = @transform_3, window_bounds = array<i64: 2, 1>}]} {
    %c0 = arith.constant 0 : index
    %c0_0 = arith.constant 0 : index
    %0 = memref.load %arg1[%c0, %c0_0] : memref<2x8xi32, #tpu.memory_space<smem>>
    %1 = arith.index_cast %0 : i32 to index
    %c0_1 = arith.constant 0 : index
    %c0_2 = arith.constant 0 : index
    %2 = vector.load %arg2[%1, %c0_1, %c0_2] : memref<50x1x128xf32, #tpu.memory_space<vmem>>, vector<1x1x128xf32>
    %3 = vector.shape_cast %2 : vector<1x1x128xf32> to vector<1x128xf32>
    %c0_3 = arith.constant 0 : index
    %c0_4 = arith.constant 0 : index
    %4 = vector.load %arg6[%c0_3, %c0_4] : memref<16x128xf32, #tpu.memory_space<vmem>>, vector<1x128xf32>
    tpu.vector_store %arg6[%c0_3, %c0_4], %3 {strides = array<i32>} : memref<16x128xf32, #tpu.memory_space<vmem>>, vector<1x128xf32>,
    %c1 = arith.constant 1 : index
    %c0_5 = arith.constant 0 : index
    %5 = memref.load %arg1[%c1, %c0_5] : memref<2x8xi32, #tpu.memory_space<smem>>
    %6 = arith.index_cast %5 : i32 to index
    %c0_6 = arith.constant 0 : index
    %c0_7 = arith.constant 0 : index
    %7 = vector.load %arg2[%6, %c0_6, %c0_7] : memref<50x1x128xf32, #tpu.memory_space<vmem>>, vector<1x1x128xf32>
    %8 = vector.shape_cast %7 : vector<1x1x128xf32> to vector<1x128xf32>
    %c1_8 = arith.constant 1 : index
    %c0_9 = arith.constant 0 : index
    %9 = vector.load %arg6[%c1_8, %c0_9] : memref<16x128xf32, #tpu.memory_space<vmem>>, vector<1x128xf32>
    tpu.vector_store %arg6[%c1_8, %c0_9], %8 {strides = array<i32>} : memref<16x128xf32, #tpu.memory_space<vmem>>, vector<1x128xf32>,
    %c0_10 = arith.constant 0 : index
    %c1_11 = arith.constant 1 : index
    %10 = memref.load %arg1[%c0_10, %c1_11] : memref<2x8xi32, #tpu.memory_space<smem>>
    %11 = arith.index_cast %10 : i32 to index
    %c0_12 = arith.constant 0 : index
    %c0_13 = arith.constant 0 : index
    %12 = vector.load %arg2[%11, %c0_12, %c0_13] : memref<50x1x128xf32, #tpu.memory_space<vmem>>, vector<1x1x128xf32>
    %13 = vector.shape_cast %12 : vector<1x1x128xf32> to vector<1x128xf32>
    %c2 = arith.constant 2 : index
    %c0_14 = arith.constant 0 : index
    %14 = vector.load %arg6[%c2, %c0_14] : memref<16x128xf32, #tpu.memory_space<vmem>>, vector<1x128xf32>
    tpu.vector_store %arg6[%c2, %c0_14], %13 {strides = array<i32>} : memref<16x128xf32, #tpu.memory_space<vmem>>, vector<1x128xf32>,
    %c1_15 = arith.constant 1 : index
    %c1_16 = arith.constant 1 : index
    %15 = memref.load %arg1[%c1_15, %c1_16] : memref<2x8xi32, #tpu.memory_space<smem>>
    %16 = arith.index_cast %15 : i32 to index
    %c0_17 = arith.constant 0 : index
    %c0_18 = arith.constant 0 : index
    %17 = vector.load %arg2[%16, %c0_17, %c0_18] : memref<50x1x128xf32, #tpu.memory_space<vmem>>, vector<1x1x128xf32>
    %18 = vector.shape_cast %17 : vector<1x1x128xf32> to vector<1x128xf32>
    %c3 = arith.constant 3 : index
    %c0_19 = arith.constant 0 : index
    %19 = vector.load %arg6[%c3, %c0_19] : memref<16x128xf32, #tpu.memory_space<vmem>>, vector<1x128xf32>
    tpu.vector_store %arg6[%c3, %c0_19], %18 {strides = array<i32>} : memref<16x128xf32, #tpu.memory_space<vmem>>, vector<1x128xf32>,
    %c0_20 = arith.constant 0 : index
    %c2_21 = arith.constant 2 : index
    %20 = memref.load %arg1[%c0_20, %c2_21] : memref<2x8xi32, #tpu.memory_space<smem>>
    %21 = arith.index_cast %20 : i32 to index
    %c0_22 = arith.constant 0 : index
    %c0_23 = arith.constant 0 : index
    %22 = vector.load %arg2[%21, %c0_22, %c0_23] : memref<50x1x128xf32, #tpu.memory_space<vmem>>, vector<1x1x128xf32>
    %23 = vector.shape_cast %22 : vector<1x1x128xf32> to vector<1x128xf32>
    %c4 = arith.constant 4 : index
    %c0_24 = arith.constant 0 : index
    %24 = vector.load %arg6[%c4, %c0_24] : memref<16x128xf32, #tpu.memory_space<vmem>>, vector<1x128xf32>
    tpu.vector_store %arg6[%c4, %c0_24], %23 {strides = array<i32>} : memref<16x128xf32, #tpu.memory_space<vmem>>, vector<1x128xf32>,
    %c1_25 = arith.constant 1 : index
    %c2_26 = arith.constant 2 : index
    %25 = memref.load %arg1[%c1_25, %c2_26] : memref<2x8xi32, #tpu.memory_space<smem>>
    %26 = arith.index_cast %25 : i32 to index
    %c0_27 = arith.constant 0 : index
    %c0_28 = arith.constant 0 : index
    %27 = vector.load %arg2[%26, %c0_27, %c0_28] : memref<50x1x128xf32, #tpu.memory_space<vmem>>, vector<1x1x128xf32>
    %28 = vector.shape_cast %27 : vector<1x1x128xf32> to vector<1x128xf32>
    %c5 = arith.constant 5 : index
    %c0_29 = arith.constant 0 : index
    %29 = vector.load %arg6[%c5, %c0_29] : memref<16x128xf32, #tpu.memory_space<vmem>>, vector<1x128xf32>
    tpu.vector_store %arg6[%c5, %c0_29], %28 {strides = array<i32>} : memref<16x128xf32, #tpu.memory_space<vmem>>, vector<1x128xf32>,
    %c0_30 = arith.constant 0 : index
    %c3_31 = arith.constant 3 : index
    %30 = memref.load %arg1[%c0_30, %c3_31] : memref<2x8xi32, #tpu.memory_space<smem>>
    %31 = arith.index_cast %30 : i32 to index
    %c0_32 = arith.constant 0 : index
    %c0_33 = arith.constant 0 : index
    %32 = vector.load %arg2[%31, %c0_32, %c0_33] : memref<50x1x128xf32, #tpu.memory_space<vmem>>, vector<1x1x128xf32>
    %33 = vector.shape_cast %32 : vector<1x1x128xf32> to vector<1x128xf32>
    %c6 = arith.constant 6 : index
    %c0_34 = arith.constant 0 : index
    %34 = vector.load %arg6[%c6, %c0_34] : memref<16x128xf32, #tpu.memory_space<vmem>>, vector<1x128xf32>
    tpu.vector_store %arg6[%c6, %c0_34], %33 {strides = array<i32>} : memref<16x128xf32, #tpu.memory_space<vmem>>, vector<1x128xf32>,
    %c1_35 = arith.constant 1 : index
    %c3_36 = arith.constant 3 : index
    %35 = memref.load %arg1[%c1_35, %c3_36] : memref<2x8xi32, #tpu.memory_space<smem>>
    %36 = arith.index_cast %35 : i32 to index
    %c0_37 = arith.constant 0 : index
    %c0_38 = arith.constant 0 : index
    %37 = vector.load %arg2[%36, %c0_37, %c0_38] : memref<50x1x128xf32, #tpu.memory_space<vmem>>, vector<1x1x128xf32>
    %38 = vector.shape_cast %37 : vector<1x1x128xf32> to vector<1x128xf32>
    %c7 = arith.constant 7 : index
    %c0_39 = arith.constant 0 : index
    %39 = vector.load %arg6[%c7, %c0_39] : memref<16x128xf32, #tpu.memory_space<vmem>>, vector<1x128xf32>
    tpu.vector_store %arg6[%c7, %c0_39], %38 {strides = array<i32>} : memref<16x128xf32, #tpu.memory_space<vmem>>, vector<1x128xf32>,
    %c0_40 = arith.constant 0 : index
    %c4_41 = arith.constant 4 : index
    %40 = memref.load %arg1[%c0_40, %c4_41] : memref<2x8xi32, #tpu.memory_space<smem>>
    %41 = arith.index_cast %40 : i32 to index
    %c0_42 = arith.constant 0 : index
    %c0_43 = arith.constant 0 : index
    %42 = vector.load %arg2[%41, %c0_42, %c0_43] : memref<50x1x128xf32, #tpu.memory_space<vmem>>, vector<1x1x128xf32>
    %43 = vector.shape_cast %42 : vector<1x1x128xf32> to vector<1x128xf32>
    %c8 = arith.constant 8 : index
    %c0_44 = arith.constant 0 : index
    %44 = vector.load %arg6[%c8, %c0_44] : memref<16x128xf32, #tpu.memory_space<vmem>>, vector<1x128xf32>
    tpu.vector_store %arg6[%c8, %c0_44], %43 {strides = array<i32>} : memref<16x128xf32, #tpu.memory_space<vmem>>, vector<1x128xf32>,
    %c1_45 = arith.constant 1 : index
    %c4_46 = arith.constant 4 : index
    %45 = memref.load %arg1[%c1_45, %c4_46] : memref<2x8xi32, #tpu.memory_space<smem>>
    %46 = arith.index_cast %45 : i32 to index
    %c0_47 = arith.constant 0 : index
    %c0_48 = arith.constant 0 : index
    %47 = vector.load %arg2[%46, %c0_47, %c0_48] : memref<50x1x128xf32, #tpu.memory_space<vmem>>, vector<1x1x128xf32>
    %48 = vector.shape_cast %47 : vector<1x1x128xf32> to vector<1x128xf32>
    %c9 = arith.constant 9 : index
    %c0_49 = arith.constant 0 : index
    %49 = vector.load %arg6[%c9, %c0_49] : memref<16x128xf32, #tpu.memory_space<vmem>>, vector<1x128xf32>
    tpu.vector_store %arg6[%c9, %c0_49], %48 {strides = array<i32>} : memref<16x128xf32, #tpu.memory_space<vmem>>, vector<1x128xf32>,
    %c0_50 = arith.constant 0 : index
    %c5_51 = arith.constant 5 : index
    %50 = memref.load %arg1[%c0_50, %c5_51] : memref<2x8xi32, #tpu.memory_space<smem>>
    %51 = arith.index_cast %50 : i32 to index
    %c0_52 = arith.constant 0 : index
    %c0_53 = arith.constant 0 : index
    %52 = vector.load %arg2[%51, %c0_52, %c0_53] : memref<50x1x128xf32, #tpu.memory_space<vmem>>, vector<1x1x128xf32>
    %53 = vector.shape_cast %52 : vector<1x1x128xf32> to vector<1x128xf32>
    %c10 = arith.constant 10 : index
    %c0_54 = arith.constant 0 : index
    %54 = vector.load %arg6[%c10, %c0_54] : memref<16x128xf32, #tpu.memory_space<vmem>>, vector<1x128xf32>
    tpu.vector_store %arg6[%c10, %c0_54], %53 {strides = array<i32>} : memref<16x128xf32, #tpu.memory_space<vmem>>, vector<1x128xf32>,
    %c1_55 = arith.constant 1 : index
    %c5_56 = arith.constant 5 : index
    %55 = memref.load %arg1[%c1_55, %c5_56] : memref<2x8xi32, #tpu.memory_space<smem>>
    %56 = arith.index_cast %55 : i32 to index
    %c0_57 = arith.constant 0 : index
    %c0_58 = arith.constant 0 : index
    %57 = vector.load %arg2[%56, %c0_57, %c0_58] : memref<50x1x128xf32, #tpu.memory_space<vmem>>, vector<1x1x128xf32>
    %58 = vector.shape_cast %57 : vector<1x1x128xf32> to vector<1x128xf32>
    %c11 = arith.constant 11 : index
    %c0_59 = arith.constant 0 : index
    %59 = vector.load %arg6[%c11, %c0_59] : memref<16x128xf32, #tpu.memory_space<vmem>>, vector<1x128xf32>
    tpu.vector_store %arg6[%c11, %c0_59], %58 {strides = array<i32>} : memref<16x128xf32, #tpu.memory_space<vmem>>, vector<1x128xf32>,
    %c0_60 = arith.constant 0 : index
    %c6_61 = arith.constant 6 : index
    %60 = memref.load %arg1[%c0_60, %c6_61] : memref<2x8xi32, #tpu.memory_space<smem>>
    %61 = arith.index_cast %60 : i32 to index
    %c0_62 = arith.constant 0 : index
    %c0_63 = arith.constant 0 : index
    %62 = vector.load %arg2[%61, %c0_62, %c0_63] : memref<50x1x128xf32, #tpu.memory_space<vmem>>, vector<1x1x128xf32>
    %63 = vector.shape_cast %62 : vector<1x1x128xf32> to vector<1x128xf32>
    %c12 = arith.constant 12 : index
    %c0_64 = arith.constant 0 : index
    %64 = vector.load %arg6[%c12, %c0_64] : memref<16x128xf32, #tpu.memory_space<vmem>>, vector<1x128xf32>
    tpu.vector_store %arg6[%c12, %c0_64], %63 {strides = array<i32>} : memref<16x128xf32, #tpu.memory_space<vmem>>, vector<1x128xf32>,
    %c1_65 = arith.constant 1 : index
    %c6_66 = arith.constant 6 : index
    %65 = memref.load %arg1[%c1_65, %c6_66] : memref<2x8xi32, #tpu.memory_space<smem>>
    %66 = arith.index_cast %65 : i32 to index
    %c0_67 = arith.constant 0 : index
    %c0_68 = arith.constant 0 : index
    %67 = vector.load %arg2[%66, %c0_67, %c0_68] : memref<50x1x128xf32, #tpu.memory_space<vmem>>, vector<1x1x128xf32>
    %68 = vector.shape_cast %67 : vector<1x1x128xf32> to vector<1x128xf32>
    %c13 = arith.constant 13 : index
    %c0_69 = arith.constant 0 : index
    %69 = vector.load %arg6[%c13, %c0_69] : memref<16x128xf32, #tpu.memory_space<vmem>>, vector<1x128xf32>
    tpu.vector_store %arg6[%c13, %c0_69], %68 {strides = array<i32>} : memref<16x128xf32, #tpu.memory_space<vmem>>, vector<1x128xf32>,
    %c0_70 = arith.constant 0 : index
    %c7_71 = arith.constant 7 : index
    %70 = memref.load %arg1[%c0_70, %c7_71] : memref<2x8xi32, #tpu.memory_space<smem>>
    %71 = arith.index_cast %70 : i32 to index
    %c0_72 = arith.constant 0 : index
    %c0_73 = arith.constant 0 : index
    %72 = vector.load %arg2[%71, %c0_72, %c0_73] : memref<50x1x128xf32, #tpu.memory_space<vmem>>, vector<1x1x128xf32>
    %73 = vector.shape_cast %72 : vector<1x1x128xf32> to vector<1x128xf32>
    %c14 = arith.constant 14 : index
    %c0_74 = arith.constant 0 : index
    %74 = vector.load %arg6[%c14, %c0_74] : memref<16x128xf32, #tpu.memory_space<vmem>>, vector<1x128xf32>
    tpu.vector_store %arg6[%c14, %c0_74], %73 {strides = array<i32>} : memref<16x128xf32, #tpu.memory_space<vmem>>, vector<1x128xf32>,
    %c1_75 = arith.constant 1 : index
    %c7_76 = arith.constant 7 : index
    %75 = memref.load %arg1[%c1_75, %c7_76] : memref<2x8xi32, #tpu.memory_space<smem>>
    %76 = arith.index_cast %75 : i32 to index
    %c0_77 = arith.constant 0 : index
    %c0_78 = arith.constant 0 : index
    %77 = vector.load %arg2[%76, %c0_77, %c0_78] : memref<50x1x128xf32, #tpu.memory_space<vmem>>, vector<1x1x128xf32>
    %78 = vector.shape_cast %77 : vector<1x1x128xf32> to vector<1x128xf32>
    %c15 = arith.constant 15 : index
    %c0_79 = arith.constant 0 : index
    %79 = vector.load %arg6[%c15, %c0_79] : memref<16x128xf32, #tpu.memory_space<vmem>>, vector<1x128xf32>
    tpu.vector_store %arg6[%c15, %c0_79], %78 {strides = array<i32>} : memref<16x128xf32, #tpu.memory_space<vmem>>, vector<1x128xf32>,
    %c0_80 = arith.constant 0 : index
    %c0_81 = arith.constant 0 : index
    %80 = vector.load %arg3[%c0_80, %c0_81] : memref<96x128xbf16, #tpu.memory_space<vmem>>, vector<32x128xbf16>
    %c32 = arith.constant 32 : index
    %c0_82 = arith.constant 0 : index
    %81 = vector.load %arg3[%c32, %c0_82] : memref<96x128xbf16, #tpu.memory_space<vmem>>, vector<32x128xbf16>
    %c64 = arith.constant 64 : index
    %c0_83 = arith.constant 0 : index
    %82 = vector.load %arg3[%c64, %c0_83] : memref<96x128xbf16, #tpu.memory_space<vmem>>, vector<32x128xbf16>
    %c0_84 = arith.constant 0 : index
    %c0_85 = arith.constant 0 : index
    %83 = vector.load %arg4[%c0_84, %c0_85] : memref<2x128xf32, #tpu.memory_space<vmem>>, vector<1x128xf32>
    %c1_86 = arith.constant 1 : index
    %c0_87 = arith.constant 0 : index
    %84 = vector.load %arg4[%c1_86, %c0_87] : memref<2x128xf32, #tpu.memory_space<vmem>>, vector<1x128xf32>
    %85 = vector.extract_strided_slice %84 {offsets = [0, 0], sizes = [1, 32], strides = [1, 1]} : vector<1x128xf32> to vector<1x32xf32>
    %86 = vector.extract_strided_slice %84 {offsets = [0, 32], sizes = [1, 1], strides = [1, 1]} : vector<1x128xf32> to vector<1x1xf32>
    %cst = arith.constant 0.000000e+00 : f32
    %87 = vector.broadcast %cst : f32 to vector<2x32xf32>
    %c0_88 = arith.constant 0 : index
    %c0_89 = arith.constant 0 : index
    %88 = vector.load %arg6[%c0_88, %c0_89] : memref<16x128xf32, #tpu.memory_space<vmem>>, vector<2x128xf32>
    %89 = arith.truncf %87 : vector<2x32xf32> to vector<2x32xbf16>
    %cst_90 = arith.constant dense<0.000000e+00> : vector<2x128xf32>
    %90 = tpu.matmul %89, %80, %cst_90 {dimension_numbers = #tpu.dot_dimension_numbers<[1], [0], [0], [1], [0, 0, 1, 1], [], []>} : vector<2x32xbf16>, vector<32x128xbf16>, vector<2x128xf32> -> vector<2x128xf32>
    %91 = arith.addf %88, %90 : vector<2x128xf32>
    %92 = arith.negf %91 : vector<2x128xf32>
    %93 = math.exp %92 : vector<2x128xf32>
    %cst_91 = arith.constant 1.000000e+00 : f32
    %94 = vector.broadcast %cst_91 : f32 to vector<2x128xf32>
    %95 = arith.addf %94, %93 : vector<2x128xf32>
    %96 = arith.divf %94, %95 : vector<2x128xf32>
    %97 = math.tanh %91 : vector<2x128xf32>
    %98 = vector.extract_strided_slice %96 {offsets = [0, 0], sizes = [2, 32], strides = [1, 1]} : vector<2x128xf32> to vector<2x32xf32>
    %99 = vector.extract_strided_slice %96 {offsets = [0, 32], sizes = [2, 32], strides = [1, 1]} : vector<2x128xf32> to vector<2x32xf32>
    %100 = vector.extract_strided_slice %97 {offsets = [0, 64], sizes = [2, 32], strides = [1, 1]} : vector<2x128xf32> to vector<2x32xf32>
    %101 = vector.extract_strided_slice %96 {offsets = [0, 96], sizes = [2, 32], strides = [1, 1]} : vector<2x128xf32> to vector<2x32xf32>
    %102 = arith.mulf %99, %87 : vector<2x32xf32>
    %103 = arith.mulf %98, %100 : vector<2x32xf32>
    %104 = arith.addf %102, %103 : vector<2x32xf32>
    %105 = math.tanh %104 : vector<2x32xf32>
    %106 = arith.mulf %101, %105 : vector<2x32xf32>
    %c2_92 = arith.constant 2 : index
    %c0_93 = arith.constant 0 : index
    %107 = vector.load %arg6[%c2_92, %c0_93] : memref<16x128xf32, #tpu.memory_space<vmem>>, vector<2x128xf32>
    %108 = arith.truncf %106 : vector<2x32xf32> to vector<2x32xbf16>
    %cst_94 = arith.constant dense<0.000000e+00> : vector<2x128xf32>
    %109 = tpu.matmul %108, %80, %cst_94 {dimension_numbers = #tpu.dot_dimension_numbers<[1], [0], [0], [1], [0, 0, 1, 1], [], []>} : vector<2x32xbf16>, vector<32x128xbf16>, vector<2x128xf32> -> vector<2x128xf32>
    %110 = arith.addf %107, %109 : vector<2x128xf32>
    %111 = arith.negf %110 : vector<2x128xf32>
    %112 = math.exp %111 : vector<2x128xf32>
    %cst_95 = arith.constant 1.000000e+00 : f32
    %113 = vector.broadcast %cst_95 : f32 to vector<2x128xf32>
    %114 = arith.addf %113, %112 : vector<2x128xf32>
    %115 = arith.divf %113, %114 : vector<2x128xf32>
    %116 = math.tanh %110 : vector<2x128xf32>
    %117 = vector.extract_strided_slice %115 {offsets = [0, 0], sizes = [2, 32], strides = [1, 1]} : vector<2x128xf32> to vector<2x32xf32>
    %118 = vector.extract_strided_slice %115 {offsets = [0, 32], sizes = [2, 32], strides = [1, 1]} : vector<2x128xf32> to vector<2x32xf32>
    %119 = vector.extract_strided_slice %116 {offsets = [0, 64], sizes = [2, 32], strides = [1, 1]} : vector<2x128xf32> to vector<2x32xf32>
    %120 = vector.extract_strided_slice %115 {offsets = [0, 96], sizes = [2, 32], strides = [1, 1]} : vector<2x128xf32> to vector<2x32xf32>
    %121 = arith.mulf %118, %104 : vector<2x32xf32>
    %122 = arith.mulf %117, %119 : vector<2x32xf32>
    %123 = arith.addf %121, %122 : vector<2x32xf32>
    %124 = math.tanh %123 : vector<2x32xf32>
    %125 = arith.mulf %120, %124 : vector<2x32xf32>
    %126 = arith.truncf %106 : vector<2x32xf32> to vector<2x32xbf16>
    %cst_96 = arith.constant dense<0.000000e+00> : vector<2x128xf32>
    %127 = tpu.matmul %126, %81, %cst_96 {dimension_numbers = #tpu.dot_dimension_numbers<[1], [0], [0], [1], [0, 0, 1, 1], [], []>} : vector<2x32xbf16>, vector<32x128xbf16>, vector<2x128xf32> -> vector<2x128xf32>
    %128 = vector.broadcast %83 : vector<1x128xf32> to vector<2x128xf32>
    %129 = arith.addf %128, %127 : vector<2x128xf32>
    %130 = arith.truncf %87 : vector<2x32xf32> to vector<2x32xbf16>
    %cst_97 = arith.constant dense<0.000000e+00> : vector<2x128xf32>
    %131 = tpu.matmul %130, %82, %cst_97 {dimension_numbers = #tpu.dot_dimension_numbers<[1], [0], [0], [1], [0, 0, 1, 1], [], []>} : vector<2x32xbf16>, vector<32x128xbf16>, vector<2x128xf32> -> vector<2x128xf32>
    %132 = arith.addf %129, %131 : vector<2x128xf32>
    %133 = arith.negf %132 : vector<2x128xf32>
    %134 = math.exp %133 : vector<2x128xf32>
    %cst_98 = arith.constant 1.000000e+00 : f32
    %135 = vector.broadcast %cst_98 : f32 to vector<2x128xf32>
    %136 = arith.addf %135, %134 : vector<2x128xf32>
    %137 = arith.divf %135, %136 : vector<2x128xf32>
    %138 = math.tanh %132 : vector<2x128xf32>
    %139 = vector.extract_strided_slice %137 {offsets = [0, 0], sizes = [2, 32], strides = [1, 1]} : vector<2x128xf32> to vector<2x32xf32>
    %140 = vector.extract_strided_slice %137 {offsets = [0, 32], sizes = [2, 32], strides = [1, 1]} : vector<2x128xf32> to vector<2x32xf32>
    %141 = vector.extract_strided_slice %138 {offsets = [0, 64], sizes = [2, 32], strides = [1, 1]} : vector<2x128xf32> to vector<2x32xf32>
    %142 = vector.extract_strided_slice %137 {offsets = [0, 96], sizes = [2, 32], strides = [1, 1]} : vector<2x128xf32> to vector<2x32xf32>
    %143 = arith.mulf %140, %87 : vector<2x32xf32>
    %144 = arith.mulf %139, %141 : vector<2x32xf32>
    %145 = arith.addf %143, %144 : vector<2x32xf32>
    %146 = math.tanh %145 : vector<2x32xf32>
    %147 = arith.mulf %142, %146 : vector<2x32xf32>
    %c4_99 = arith.constant 4 : index
    %c0_100 = arith.constant 0 : index
    %148 = vector.load %arg6[%c4_99, %c0_100] : memref<16x128xf32, #tpu.memory_space<vmem>>, vector<2x128xf32>
    %149 = arith.truncf %125 : vector<2x32xf32> to vector<2x32xbf16>
    %cst_101 = arith.constant dense<0.000000e+00> : vector<2x128xf32>
    %150 = tpu.matmul %149, %80, %cst_101 {dimension_numbers = #tpu.dot_dimension_numbers<[1], [0], [0], [1], [0, 0, 1, 1], [], []>} : vector<2x32xbf16>, vector<32x128xbf16>, vector<2x128xf32> -> vector<2x128xf32>
    %151 = arith.addf %148, %150 : vector<2x128xf32>
    %152 = arith.negf %151 : vector<2x128xf32>
    %153 = math.exp %152 : vector<2x128xf32>
    %cst_102 = arith.constant 1.000000e+00 : f32
    %154 = vector.broadcast %cst_102 : f32 to vector<2x128xf32>
    %155 = arith.addf %154, %153 : vector<2x128xf32>
    %156 = arith.divf %154, %155 : vector<2x128xf32>
    %157 = math.tanh %151 : vector<2x128xf32>
    %158 = vector.extract_strided_slice %156 {offsets = [0, 0], sizes = [2, 32], strides = [1, 1]} : vector<2x128xf32> to vector<2x32xf32>
    %159 = vector.extract_strided_slice %156 {offsets = [0, 32], sizes = [2, 32], strides = [1, 1]} : vector<2x128xf32> to vector<2x32xf32>
    %160 = vector.extract_strided_slice %157 {offsets = [0, 64], sizes = [2, 32], strides = [1, 1]} : vector<2x128xf32> to vector<2x32xf32>
    %161 = vector.extract_strided_slice %156 {offsets = [0, 96], sizes = [2, 32], strides = [1, 1]} : vector<2x128xf32> to vector<2x32xf32>
    %162 = arith.mulf %159, %123 : vector<2x32xf32>
    %163 = arith.mulf %158, %160 : vector<2x32xf32>
    %164 = arith.addf %162, %163 : vector<2x32xf32>
    %165 = math.tanh %164 : vector<2x32xf32>
    %166 = arith.mulf %161, %165 : vector<2x32xf32>
    %167 = arith.truncf %125 : vector<2x32xf32> to vector<2x32xbf16>
    %cst_103 = arith.constant dense<0.000000e+00> : vector<2x128xf32>
    %168 = tpu.matmul %167, %81, %cst_103 {dimension_numbers = #tpu.dot_dimension_numbers<[1], [0], [0], [1], [0, 0, 1, 1], [], []>} : vector<2x32xbf16>, vector<32x128xbf16>, vector<2x128xf32> -> vector<2x128xf32>
    %169 = vector.broadcast %83 : vector<1x128xf32> to vector<2x128xf32>
    %170 = arith.addf %169, %168 : vector<2x128xf32>
    %171 = arith.truncf %147 : vector<2x32xf32> to vector<2x32xbf16>
    %cst_104 = arith.constant dense<0.000000e+00> : vector<2x128xf32>
    %172 = tpu.matmul %171, %82, %cst_104 {dimension_numbers = #tpu.dot_dimension_numbers<[1], [0], [0], [1], [0, 0, 1, 1], [], []>} : vector<2x32xbf16>, vector<32x128xbf16>, vector<2x128xf32> -> vector<2x128xf32>
    %173 = arith.addf %170, %172 : vector<2x128xf32>
    %174 = arith.negf %173 : vector<2x128xf32>
    %175 = math.exp %174 : vector<2x128xf32>
    %cst_105 = arith.constant 1.000000e+00 : f32
    %176 = vector.broadcast %cst_105 : f32 to vector<2x128xf32>
    %177 = arith.addf %176, %175 : vector<2x128xf32>
    %178 = arith.divf %176, %177 : vector<2x128xf32>
    %179 = math.tanh %173 : vector<2x128xf32>
    %180 = vector.extract_strided_slice %178 {offsets = [0, 0], sizes = [2, 32], strides = [1, 1]} : vector<2x128xf32> to vector<2x32xf32>
    %181 = vector.extract_strided_slice %178 {offsets = [0, 32], sizes = [2, 32], strides = [1, 1]} : vector<2x128xf32> to vector<2x32xf32>
    %182 = vector.extract_strided_slice %179 {offsets = [0, 64], sizes = [2, 32], strides = [1, 1]} : vector<2x128xf32> to vector<2x32xf32>
    %183 = vector.extract_strided_slice %178 {offsets = [0, 96], sizes = [2, 32], strides = [1, 1]} : vector<2x128xf32> to vector<2x32xf32>
    %184 = arith.mulf %181, %145 : vector<2x32xf32>
    %185 = arith.mulf %180, %182 : vector<2x32xf32>
    %186 = arith.addf %184, %185 : vector<2x32xf32>
    %187 = math.tanh %186 : vector<2x32xf32>
    %188 = arith.mulf %183, %187 : vector<2x32xf32>
    %c6_106 = arith.constant 6 : index
    %c0_107 = arith.constant 0 : index
    %189 = vector.load %arg6[%c6_106, %c0_107] : memref<16x128xf32, #tpu.memory_space<vmem>>, vector<2x128xf32>
    %190 = arith.truncf %166 : vector<2x32xf32> to vector<2x32xbf16>
    %cst_108 = arith.constant dense<0.000000e+00> : vector<2x128xf32>
    %191 = tpu.matmul %190, %80, %cst_108 {dimension_numbers = #tpu.dot_dimension_numbers<[1], [0], [0], [1], [0, 0, 1, 1], [], []>} : vector<2x32xbf16>, vector<32x128xbf16>, vector<2x128xf32> -> vector<2x128xf32>
    %192 = arith.addf %189, %191 : vector<2x128xf32>
    %193 = arith.negf %192 : vector<2x128xf32>
    %194 = math.exp %193 : vector<2x128xf32>
    %cst_109 = arith.constant 1.000000e+00 : f32
    %195 = vector.broadcast %cst_109 : f32 to vector<2x128xf32>
    %196 = arith.addf %195, %194 : vector<2x128xf32>
    %197 = arith.divf %195, %196 : vector<2x128xf32>
    %198 = math.tanh %192 : vector<2x128xf32>
    %199 = vector.extract_strided_slice %197 {offsets = [0, 0], sizes = [2, 32], strides = [1, 1]} : vector<2x128xf32> to vector<2x32xf32>
    %200 = vector.extract_strided_slice %197 {offsets = [0, 32], sizes = [2, 32], strides = [1, 1]} : vector<2x128xf32> to vector<2x32xf32>
    %201 = vector.extract_strided_slice %198 {offsets = [0, 64], sizes = [2, 32], strides = [1, 1]} : vector<2x128xf32> to vector<2x32xf32>
    %202 = vector.extract_strided_slice %197 {offsets = [0, 96], sizes = [2, 32], strides = [1, 1]} : vector<2x128xf32> to vector<2x32xf32>
    %203 = arith.mulf %200, %164 : vector<2x32xf32>
    %204 = arith.mulf %199, %201 : vector<2x32xf32>
    %205 = arith.addf %203, %204 : vector<2x32xf32>
    %206 = math.tanh %205 : vector<2x32xf32>
    %207 = arith.mulf %202, %206 : vector<2x32xf32>
    %208 = arith.truncf %166 : vector<2x32xf32> to vector<2x32xbf16>
    %cst_110 = arith.constant dense<0.000000e+00> : vector<2x128xf32>
    %209 = tpu.matmul %208, %81, %cst_110 {dimension_numbers = #tpu.dot_dimension_numbers<[1], [0], [0], [1], [0, 0, 1, 1], [], []>} : vector<2x32xbf16>, vector<32x128xbf16>, vector<2x128xf32> -> vector<2x128xf32>
    %210 = vector.broadcast %83 : vector<1x128xf32> to vector<2x128xf32>
    %211 = arith.addf %210, %209 : vector<2x128xf32>
    %212 = arith.truncf %188 : vector<2x32xf32> to vector<2x32xbf16>
    %cst_111 = arith.constant dense<0.000000e+00> : vector<2x128xf32>
    %213 = tpu.matmul %212, %82, %cst_111 {dimension_numbers = #tpu.dot_dimension_numbers<[1], [0], [0], [1], [0, 0, 1, 1], [], []>} : vector<2x32xbf16>, vector<32x128xbf16>, vector<2x128xf32> -> vector<2x128xf32>
    %214 = arith.addf %211, %213 : vector<2x128xf32>
    %215 = arith.negf %214 : vector<2x128xf32>
    %216 = math.exp %215 : vector<2x128xf32>
    %cst_112 = arith.constant 1.000000e+00 : f32
    %217 = vector.broadcast %cst_112 : f32 to vector<2x128xf32>
    %218 = arith.addf %217, %216 : vector<2x128xf32>
    %219 = arith.divf %217, %218 : vector<2x128xf32>
    %220 = math.tanh %214 : vector<2x128xf32>
    %221 = vector.extract_strided_slice %219 {offsets = [0, 0], sizes = [2, 32], strides = [1, 1]} : vector<2x128xf32> to vector<2x32xf32>
    %222 = vector.extract_strided_slice %219 {offsets = [0, 32], sizes = [2, 32], strides = [1, 1]} : vector<2x128xf32> to vector<2x32xf32>
    %223 = vector.extract_strided_slice %220 {offsets = [0, 64], sizes = [2, 32], strides = [1, 1]} : vector<2x128xf32> to vector<2x32xf32>
    %224 = vector.extract_strided_slice %219 {offsets = [0, 96], sizes = [2, 32], strides = [1, 1]} : vector<2x128xf32> to vector<2x32xf32>
    %225 = arith.mulf %222, %186 : vector<2x32xf32>
    %226 = arith.mulf %221, %223 : vector<2x32xf32>
    %227 = arith.addf %225, %226 : vector<2x32xf32>
    %228 = math.tanh %227 : vector<2x32xf32>
    %229 = arith.mulf %224, %228 : vector<2x32xf32>
    %c8_113 = arith.constant 8 : index
    %c0_114 = arith.constant 0 : index
    %230 = vector.load %arg6[%c8_113, %c0_114] : memref<16x128xf32, #tpu.memory_space<vmem>>, vector<2x128xf32>
    %231 = arith.truncf %207 : vector<2x32xf32> to vector<2x32xbf16>
    %cst_115 = arith.constant dense<0.000000e+00> : vector<2x128xf32>
    %232 = tpu.matmul %231, %80, %cst_115 {dimension_numbers = #tpu.dot_dimension_numbers<[1], [0], [0], [1], [0, 0, 1, 1], [], []>} : vector<2x32xbf16>, vector<32x128xbf16>, vector<2x128xf32> -> vector<2x128xf32>
    %233 = arith.addf %230, %232 : vector<2x128xf32>
    %234 = arith.negf %233 : vector<2x128xf32>
    %235 = math.exp %234 : vector<2x128xf32>
    %cst_116 = arith.constant 1.000000e+00 : f32
    %236 = vector.broadcast %cst_116 : f32 to vector<2x128xf32>
    %237 = arith.addf %236, %235 : vector<2x128xf32>
    %238 = arith.divf %236, %237 : vector<2x128xf32>
    %239 = math.tanh %233 : vector<2x128xf32>
    %240 = vector.extract_strided_slice %238 {offsets = [0, 0], sizes = [2, 32], strides = [1, 1]} : vector<2x128xf32> to vector<2x32xf32>
    %241 = vector.extract_strided_slice %238 {offsets = [0, 32], sizes = [2, 32], strides = [1, 1]} : vector<2x128xf32> to vector<2x32xf32>
    %242 = vector.extract_strided_slice %239 {offsets = [0, 64], sizes = [2, 32], strides = [1, 1]} : vector<2x128xf32> to vector<2x32xf32>
    %243 = vector.extract_strided_slice %238 {offsets = [0, 96], sizes = [2, 32], strides = [1, 1]} : vector<2x128xf32> to vector<2x32xf32>
    %244 = arith.mulf %241, %205 : vector<2x32xf32>
    %245 = arith.mulf %240, %242 : vector<2x32xf32>
    %246 = arith.addf %244, %245 : vector<2x32xf32>
    %247 = math.tanh %246 : vector<2x32xf32>
    %248 = arith.mulf %243, %247 : vector<2x32xf32>
    %249 = arith.truncf %207 : vector<2x32xf32> to vector<2x32xbf16>
    %cst_117 = arith.constant dense<0.000000e+00> : vector<2x128xf32>
    %250 = tpu.matmul %249, %81, %cst_117 {dimension_numbers = #tpu.dot_dimension_numbers<[1], [0], [0], [1], [0, 0, 1, 1], [], []>} : vector<2x32xbf16>, vector<32x128xbf16>, vector<2x128xf32> -> vector<2x128xf32>
    %251 = vector.broadcast %83 : vector<1x128xf32> to vector<2x128xf32>
    %252 = arith.addf %251, %250 : vector<2x128xf32>
    %253 = arith.truncf %229 : vector<2x32xf32> to vector<2x32xbf16>
    %cst_118 = arith.constant dense<0.000000e+00> : vector<2x128xf32>
    %254 = tpu.matmul %253, %82, %cst_118 {dimension_numbers = #tpu.dot_dimension_numbers<[1], [0], [0], [1], [0, 0, 1, 1], [], []>} : vector<2x32xbf16>, vector<32x128xbf16>, vector<2x128xf32> -> vector<2x128xf32>
    %255 = arith.addf %252, %254 : vector<2x128xf32>
    %256 = arith.negf %255 : vector<2x128xf32>
    %257 = math.exp %256 : vector<2x128xf32>
    %cst_119 = arith.constant 1.000000e+00 : f32
    %258 = vector.broadcast %cst_119 : f32 to vector<2x128xf32>
    %259 = arith.addf %258, %257 : vector<2x128xf32>
    %260 = arith.divf %258, %259 : vector<2x128xf32>
    %261 = math.tanh %255 : vector<2x128xf32>
    %262 = vector.extract_strided_slice %260 {offsets = [0, 0], sizes = [2, 32], strides = [1, 1]} : vector<2x128xf32> to vector<2x32xf32>
    %263 = vector.extract_strided_slice %260 {offsets = [0, 32], sizes = [2, 32], strides = [1, 1]} : vector<2x128xf32> to vector<2x32xf32>
    %264 = vector.extract_strided_slice %261 {offsets = [0, 64], sizes = [2, 32], strides = [1, 1]} : vector<2x128xf32> to vector<2x32xf32>
    %265 = vector.extract_strided_slice %260 {offsets = [0, 96], sizes = [2, 32], strides = [1, 1]} : vector<2x128xf32> to vector<2x32xf32>
    %266 = arith.mulf %263, %227 : vector<2x32xf32>
    %267 = arith.mulf %262, %264 : vector<2x32xf32>
    %268 = arith.addf %266, %267 : vector<2x32xf32>
    %269 = math.tanh %268 : vector<2x32xf32>
    %270 = arith.mulf %265, %269 : vector<2x32xf32>
    %c10_120 = arith.constant 10 : index
    %c0_121 = arith.constant 0 : index
    %271 = vector.load %arg6[%c10_120, %c0_121] : memref<16x128xf32, #tpu.memory_space<vmem>>, vector<2x128xf32>
    %272 = arith.truncf %248 : vector<2x32xf32> to vector<2x32xbf16>
    %cst_122 = arith.constant dense<0.000000e+00> : vector<2x128xf32>
    %273 = tpu.matmul %272, %80, %cst_122 {dimension_numbers = #tpu.dot_dimension_numbers<[1], [0], [0], [1], [0, 0, 1, 1], [], []>} : vector<2x32xbf16>, vector<32x128xbf16>, vector<2x128xf32> -> vector<2x128xf32>
    %274 = arith.addf %271, %273 : vector<2x128xf32>
    %275 = arith.negf %274 : vector<2x128xf32>
    %276 = math.exp %275 : vector<2x128xf32>
    %cst_123 = arith.constant 1.000000e+00 : f32
    %277 = vector.broadcast %cst_123 : f32 to vector<2x128xf32>
    %278 = arith.addf %277, %276 : vector<2x128xf32>
    %279 = arith.divf %277, %278 : vector<2x128xf32>
    %280 = math.tanh %274 : vector<2x128xf32>
    %281 = vector.extract_strided_slice %279 {offsets = [0, 0], sizes = [2, 32], strides = [1, 1]} : vector<2x128xf32> to vector<2x32xf32>
    %282 = vector.extract_strided_slice %279 {offsets = [0, 32], sizes = [2, 32], strides = [1, 1]} : vector<2x128xf32> to vector<2x32xf32>
    %283 = vector.extract_strided_slice %280 {offsets = [0, 64], sizes = [2, 32], strides = [1, 1]} : vector<2x128xf32> to vector<2x32xf32>
    %284 = vector.extract_strided_slice %279 {offsets = [0, 96], sizes = [2, 32], strides = [1, 1]} : vector<2x128xf32> to vector<2x32xf32>
    %285 = arith.mulf %282, %246 : vector<2x32xf32>
    %286 = arith.mulf %281, %283 : vector<2x32xf32>
    %287 = arith.addf %285, %286 : vector<2x32xf32>
    %288 = math.tanh %287 : vector<2x32xf32>
    %289 = arith.mulf %284, %288 : vector<2x32xf32>
    %290 = arith.truncf %248 : vector<2x32xf32> to vector<2x32xbf16>
    %cst_124 = arith.constant dense<0.000000e+00> : vector<2x128xf32>
    %291 = tpu.matmul %290, %81, %cst_124 {dimension_numbers = #tpu.dot_dimension_numbers<[1], [0], [0], [1], [0, 0, 1, 1], [], []>} : vector<2x32xbf16>, vector<32x128xbf16>, vector<2x128xf32> -> vector<2x128xf32>
    %292 = vector.broadcast %83 : vector<1x128xf32> to vector<2x128xf32>
    %293 = arith.addf %292, %291 : vector<2x128xf32>
    %294 = arith.truncf %270 : vector<2x32xf32> to vector<2x32xbf16>
    %cst_125 = arith.constant dense<0.000000e+00> : vector<2x128xf32>
    %295 = tpu.matmul %294, %82, %cst_125 {dimension_numbers = #tpu.dot_dimension_numbers<[1], [0], [0], [1], [0, 0, 1, 1], [], []>} : vector<2x32xbf16>, vector<32x128xbf16>, vector<2x128xf32> -> vector<2x128xf32>
    %296 = arith.addf %293, %295 : vector<2x128xf32>
    %297 = arith.negf %296 : vector<2x128xf32>
    %298 = math.exp %297 : vector<2x128xf32>
    %cst_126 = arith.constant 1.000000e+00 : f32
    %299 = vector.broadcast %cst_126 : f32 to vector<2x128xf32>
    %300 = arith.addf %299, %298 : vector<2x128xf32>
    %301 = arith.divf %299, %300 : vector<2x128xf32>
    %302 = math.tanh %296 : vector<2x128xf32>
    %303 = vector.extract_strided_slice %301 {offsets = [0, 0], sizes = [2, 32], strides = [1, 1]} : vector<2x128xf32> to vector<2x32xf32>
    %304 = vector.extract_strided_slice %301 {offsets = [0, 32], sizes = [2, 32], strides = [1, 1]} : vector<2x128xf32> to vector<2x32xf32>
    %305 = vector.extract_strided_slice %302 {offsets = [0, 64], sizes = [2, 32], strides = [1, 1]} : vector<2x128xf32> to vector<2x32xf32>
    %306 = vector.extract_strided_slice %301 {offsets = [0, 96], sizes = [2, 32], strides = [1, 1]} : vector<2x128xf32> to vector<2x32xf32>
    %307 = arith.mulf %304, %268 : vector<2x32xf32>
    %308 = arith.mulf %303, %305 : vector<2x32xf32>
    %309 = arith.addf %307, %308 : vector<2x32xf32>
    %310 = math.tanh %309 : vector<2x32xf32>
    %311 = arith.mulf %306, %310 : vector<2x32xf32>
    %c12_127 = arith.constant 12 : index
    %c0_128 = arith.constant 0 : index
    %312 = vector.load %arg6[%c12_127, %c0_128] : memref<16x128xf32, #tpu.memory_space<vmem>>, vector<2x128xf32>
    %313 = arith.truncf %289 : vector<2x32xf32> to vector<2x32xbf16>
    %cst_129 = arith.constant dense<0.000000e+00> : vector<2x128xf32>
    %314 = tpu.matmul %313, %80, %cst_129 {dimension_numbers = #tpu.dot_dimension_numbers<[1], [0], [0], [1], [0, 0, 1, 1], [], []>} : vector<2x32xbf16>, vector<32x128xbf16>, vector<2x128xf32> -> vector<2x128xf32>
    %315 = arith.addf %312, %314 : vector<2x128xf32>
    %316 = arith.negf %315 : vector<2x128xf32>
    %317 = math.exp %316 : vector<2x128xf32>
    %cst_130 = arith.constant 1.000000e+00 : f32
    %318 = vector.broadcast %cst_130 : f32 to vector<2x128xf32>
    %319 = arith.addf %318, %317 : vector<2x128xf32>
    %320 = arith.divf %318, %319 : vector<2x128xf32>
    %321 = math.tanh %315 : vector<2x128xf32>
    %322 = vector.extract_strided_slice %320 {offsets = [0, 0], sizes = [2, 32], strides = [1, 1]} : vector<2x128xf32> to vector<2x32xf32>
    %323 = vector.extract_strided_slice %320 {offsets = [0, 32], sizes = [2, 32], strides = [1, 1]} : vector<2x128xf32> to vector<2x32xf32>
    %324 = vector.extract_strided_slice %321 {offsets = [0, 64], sizes = [2, 32], strides = [1, 1]} : vector<2x128xf32> to vector<2x32xf32>
    %325 = vector.extract_strided_slice %320 {offsets = [0, 96], sizes = [2, 32], strides = [1, 1]} : vector<2x128xf32> to vector<2x32xf32>
    %326 = arith.mulf %323, %287 : vector<2x32xf32>
    %327 = arith.mulf %322, %324 : vector<2x32xf32>
    %328 = arith.addf %326, %327 : vector<2x32xf32>
    %329 = math.tanh %328 : vector<2x32xf32>
    %330 = arith.mulf %325, %329 : vector<2x32xf32>
    %331 = arith.truncf %289 : vector<2x32xf32> to vector<2x32xbf16>
    %cst_131 = arith.constant dense<0.000000e+00> : vector<2x128xf32>
    %332 = tpu.matmul %331, %81, %cst_131 {dimension_numbers = #tpu.dot_dimension_numbers<[1], [0], [0], [1], [0, 0, 1, 1], [], []>} : vector<2x32xbf16>, vector<32x128xbf16>, vector<2x128xf32> -> vector<2x128xf32>
    %333 = vector.broadcast %83 : vector<1x128xf32> to vector<2x128xf32>
    %334 = arith.addf %333, %332 : vector<2x128xf32>
    %335 = arith.truncf %311 : vector<2x32xf32> to vector<2x32xbf16>
    %cst_132 = arith.constant dense<0.000000e+00> : vector<2x128xf32>
    %336 = tpu.matmul %335, %82, %cst_132 {dimension_numbers = #tpu.dot_dimension_numbers<[1], [0], [0], [1], [0, 0, 1, 1], [], []>} : vector<2x32xbf16>, vector<32x128xbf16>, vector<2x128xf32> -> vector<2x128xf32>
    %337 = arith.addf %334, %336 : vector<2x128xf32>
    %338 = arith.negf %337 : vector<2x128xf32>
    %339 = math.exp %338 : vector<2x128xf32>
    %cst_133 = arith.constant 1.000000e+00 : f32
    %340 = vector.broadcast %cst_133 : f32 to vector<2x128xf32>
    %341 = arith.addf %340, %339 : vector<2x128xf32>
    %342 = arith.divf %340, %341 : vector<2x128xf32>
    %343 = math.tanh %337 : vector<2x128xf32>
    %344 = vector.extract_strided_slice %342 {offsets = [0, 0], sizes = [2, 32], strides = [1, 1]} : vector<2x128xf32> to vector<2x32xf32>
    %345 = vector.extract_strided_slice %342 {offsets = [0, 32], sizes = [2, 32], strides = [1, 1]} : vector<2x128xf32> to vector<2x32xf32>
    %346 = vector.extract_strided_slice %343 {offsets = [0, 64], sizes = [2, 32], strides = [1, 1]} : vector<2x128xf32> to vector<2x32xf32>
    %347 = vector.extract_strided_slice %342 {offsets = [0, 96], sizes = [2, 32], strides = [1, 1]} : vector<2x128xf32> to vector<2x32xf32>
    %348 = arith.mulf %345, %309 : vector<2x32xf32>
    %349 = arith.mulf %344, %346 : vector<2x32xf32>
    %350 = arith.addf %348, %349 : vector<2x32xf32>
    %351 = math.tanh %350 : vector<2x32xf32>
    %352 = arith.mulf %347, %351 : vector<2x32xf32>
    %c14_134 = arith.constant 14 : index
    %c0_135 = arith.constant 0 : index
    %353 = vector.load %arg6[%c14_134, %c0_135] : memref<16x128xf32, #tpu.memory_space<vmem>>, vector<2x128xf32>
    %354 = arith.truncf %330 : vector<2x32xf32> to vector<2x32xbf16>
    %cst_136 = arith.constant dense<0.000000e+00> : vector<2x128xf32>
    %355 = tpu.matmul %354, %80, %cst_136 {dimension_numbers = #tpu.dot_dimension_numbers<[1], [0], [0], [1], [0, 0, 1, 1], [], []>} : vector<2x32xbf16>, vector<32x128xbf16>, vector<2x128xf32> -> vector<2x128xf32>
    %356 = arith.addf %353, %355 : vector<2x128xf32>
    %357 = arith.negf %356 : vector<2x128xf32>
    %358 = math.exp %357 : vector<2x128xf32>
    %cst_137 = arith.constant 1.000000e+00 : f32
    %359 = vector.broadcast %cst_137 : f32 to vector<2x128xf32>
    %360 = arith.addf %359, %358 : vector<2x128xf32>
    %361 = arith.divf %359, %360 : vector<2x128xf32>
    %362 = math.tanh %356 : vector<2x128xf32>
    %363 = vector.extract_strided_slice %361 {offsets = [0, 0], sizes = [2, 32], strides = [1, 1]} : vector<2x128xf32> to vector<2x32xf32>
    %364 = vector.extract_strided_slice %361 {offsets = [0, 32], sizes = [2, 32], strides = [1, 1]} : vector<2x128xf32> to vector<2x32xf32>
    %365 = vector.extract_strided_slice %362 {offsets = [0, 64], sizes = [2, 32], strides = [1, 1]} : vector<2x128xf32> to vector<2x32xf32>
    %366 = vector.extract_strided_slice %361 {offsets = [0, 96], sizes = [2, 32], strides = [1, 1]} : vector<2x128xf32> to vector<2x32xf32>
    %367 = arith.mulf %364, %328 : vector<2x32xf32>
    %368 = arith.mulf %363, %365 : vector<2x32xf32>
    %369 = arith.addf %367, %368 : vector<2x32xf32>
    %370 = math.tanh %369 : vector<2x32xf32>
    %371 = arith.mulf %366, %370 : vector<2x32xf32>
    %372 = arith.truncf %330 : vector<2x32xf32> to vector<2x32xbf16>
    %cst_138 = arith.constant dense<0.000000e+00> : vector<2x128xf32>
    %373 = tpu.matmul %372, %81, %cst_138 {dimension_numbers = #tpu.dot_dimension_numbers<[1], [0], [0], [1], [0, 0, 1, 1], [], []>} : vector<2x32xbf16>, vector<32x128xbf16>, vector<2x128xf32> -> vector<2x128xf32>
    %374 = vector.broadcast %83 : vector<1x128xf32> to vector<2x128xf32>
    %375 = arith.addf %374, %373 : vector<2x128xf32>
    %376 = arith.truncf %352 : vector<2x32xf32> to vector<2x32xbf16>
    %cst_139 = arith.constant dense<0.000000e+00> : vector<2x128xf32>
    %377 = tpu.matmul %376, %82, %cst_139 {dimension_numbers = #tpu.dot_dimension_numbers<[1], [0], [0], [1], [0, 0, 1, 1], [], []>} : vector<2x32xbf16>, vector<32x128xbf16>, vector<2x128xf32> -> vector<2x128xf32>
    %378 = arith.addf %375, %377 : vector<2x128xf32>
    %379 = arith.negf %378 : vector<2x128xf32>
    %380 = math.exp %379 : vector<2x128xf32>
    %cst_140 = arith.constant 1.000000e+00 : f32
    %381 = vector.broadcast %cst_140 : f32 to vector<2x128xf32>
    %382 = arith.addf %381, %380 : vector<2x128xf32>
    %383 = arith.divf %381, %382 : vector<2x128xf32>
    %384 = math.tanh %378 : vector<2x128xf32>
    %385 = vector.extract_strided_slice %383 {offsets = [0, 0], sizes = [2, 32], strides = [1, 1]} : vector<2x128xf32> to vector<2x32xf32>
    %386 = vector.extract_strided_slice %383 {offsets = [0, 32], sizes = [2, 32], strides = [1, 1]} : vector<2x128xf32> to vector<2x32xf32>
    %387 = vector.extract_strided_slice %384 {offsets = [0, 64], sizes = [2, 32], strides = [1, 1]} : vector<2x128xf32> to vector<2x32xf32>
    %388 = vector.extract_strided_slice %383 {offsets = [0, 96], sizes = [2, 32], strides = [1, 1]} : vector<2x128xf32> to vector<2x32xf32>
    %389 = arith.mulf %386, %350 : vector<2x32xf32>
    %390 = arith.mulf %385, %387 : vector<2x32xf32>
    %391 = arith.addf %389, %390 : vector<2x32xf32>
    %392 = math.tanh %391 : vector<2x32xf32>
    %393 = arith.mulf %388, %392 : vector<2x32xf32>
    %394 = arith.truncf %371 : vector<2x32xf32> to vector<2x32xbf16>
    %cst_141 = arith.constant dense<0.000000e+00> : vector<2x128xf32>
    %395 = tpu.matmul %394, %81, %cst_141 {dimension_numbers = #tpu.dot_dimension_numbers<[1], [0], [0], [1], [0, 0, 1, 1], [], []>} : vector<2x32xbf16>, vector<32x128xbf16>, vector<2x128xf32> -> vector<2x128xf32>
    %396 = vector.broadcast %83 : vector<1x128xf32> to vector<2x128xf32>
    %397 = arith.addf %396, %395 : vector<2x128xf32>
    %398 = arith.truncf %393 : vector<2x32xf32> to vector<2x32xbf16>
    %cst_142 = arith.constant dense<0.000000e+00> : vector<2x128xf32>
    %399 = tpu.matmul %398, %82, %cst_142 {dimension_numbers = #tpu.dot_dimension_numbers<[1], [0], [0], [1], [0, 0, 1, 1], [], []>} : vector<2x32xbf16>, vector<32x128xbf16>, vector<2x128xf32> -> vector<2x128xf32>
    %400 = arith.addf %397, %399 : vector<2x128xf32>
    %401 = arith.negf %400 : vector<2x128xf32>
    %402 = math.exp %401 : vector<2x128xf32>
    %cst_143 = arith.constant 1.000000e+00 : f32
    %403 = vector.broadcast %cst_143 : f32 to vector<2x128xf32>
    %404 = arith.addf %403, %402 : vector<2x128xf32>
    %405 = arith.divf %403, %404 : vector<2x128xf32>
    %406 = math.tanh %400 : vector<2x128xf32>
    %407 = vector.extract_strided_slice %405 {offsets = [0, 0], sizes = [2, 32], strides = [1, 1]} : vector<2x128xf32> to vector<2x32xf32>
    %408 = vector.extract_strided_slice %405 {offsets = [0, 32], sizes = [2, 32], strides = [1, 1]} : vector<2x128xf32> to vector<2x32xf32>
    %409 = vector.extract_strided_slice %406 {offsets = [0, 64], sizes = [2, 32], strides = [1, 1]} : vector<2x128xf32> to vector<2x32xf32>
    %410 = vector.extract_strided_slice %405 {offsets = [0, 96], sizes = [2, 32], strides = [1, 1]} : vector<2x128xf32> to vector<2x32xf32>
    %411 = arith.mulf %408, %391 : vector<2x32xf32>
    %412 = arith.mulf %407, %409 : vector<2x32xf32>
    %413 = arith.addf %411, %412 : vector<2x32xf32>
    %414 = math.tanh %413 : vector<2x32xf32>
    %415 = arith.mulf %410, %414 : vector<2x32xf32>
    %416 = vector.broadcast %85 : vector<1x32xf32> to vector<2x32xf32>
    %417 = arith.mulf %415, %416 : vector<2x32xf32>
    %cst_144 = arith.constant dense<0.000000e+00> : vector<2xf32>
    %418 = vector.multi_reduction <add>, %417, %cst_144 [1] : vector<2x32xf32> to vector<2xf32>
    %419 = vector.shape_cast %418 : vector<2xf32> to vector<2x1xf32>
    %420 = vector.broadcast %86 : vector<1x1xf32> to vector<2x1xf32>
    %421 = arith.addf %419, %420 : vector<2x1xf32>
    %422 = arith.negf %421 : vector<2x1xf32>
    %423 = math.exp %422 : vector<2x1xf32>
    %cst_145 = arith.constant 1.000000e+00 : f32
    %424 = vector.broadcast %cst_145 : f32 to vector<2x1xf32>
    %425 = arith.addf %424, %423 : vector<2x1xf32>
    %426 = arith.divf %424, %425 : vector<2x1xf32>
    %c0_146 = arith.constant 0 : index
    %c0_147 = arith.constant 0 : index
    %427 = vector.load %arg5[%c0_146, %c0_147] : memref<2x1xf32, #tpu.memory_space<vmem>>, vector<2x1xf32>
    tpu.vector_store %arg5[%c0_146, %c0_147], %426 {strides = array<i32>} : memref<2x1xf32, #tpu.memory_space<vmem>>, vector<2x1xf32>,
    return
  }
  func.func @transform_0(%arg0: i32, %arg1: memref<2x8xi32, #tpu.memory_space<smem>>) -> (i32, i32, i32) {
    %c0_i32 = arith.constant 0 : i32
    %c0_i32_0 = arith.constant 0 : i32
    %c0_i32_1 = arith.constant 0 : i32
    %c0_i32_2 = arith.constant 0 : i32
    return %c0_i32, %c0_i32_0, %c0_i32_1 : i32, i32, i32
  }
  func.func @transform_1(%arg0: i32, %arg1: memref<2x8xi32, #tpu.memory_space<smem>>) -> (i32, i32) {
    %c0_i32 = arith.constant 0 : i32
    %c0_i32_0 = arith.constant 0 : i32
    %c0_i32_1 = arith.constant 0 : i32
    return %c0_i32, %c0_i32_0 : i32, i32
  }
  func.func @transform_2(%arg0: i32, %arg1: memref<2x8xi32, #tpu.memory_space<smem>>) -> (i32, i32) {
    %c0_i32 = arith.constant 0 : i32
    %c0_i32_0 = arith.constant 0 : i32
    %c0_i32_1 = arith.constant 0 : i32
    return %c0_i32, %c0_i32_0 : i32, i32
  }
  func.func @transform_3(%arg0: i32, %arg1: memref<2x8xi32, #tpu.memory_space<smem>>) -> (i32, i32) {
    %c0_i32 = arith.constant 0 : i32
    %c0_i32_0 = arith.constant 0 : i32
    %c0_i32_1 = arith.constant 0 : i32
    return %c0_i32, %c0_i32_0 : i32, i32
  }
}

</mosaic_0001>

<bundles_post_ra>
// kernel: text_lstm_forward.1
= control target key start
LH: loop header
LB: loop body
LE: loop exit
PB: predicated region body
PF: predicated region fallthrough
CT: control target
= control target key end

     0   :  { %s1573_s18 = smov [#allocation4]   ;;  %s1843_s0 = inlined_call_operand.vmem [shape: s32[2,8], index: 0, kind: input, shape index: {}]   ;;  %s1844_s1 = inlined_call_operand.hbm [shape: f32[50,1,128], index: 1, kind: input, shape index: {}]   ;;  %s1845_s2 = inlined_call_operand.hbm [shape: bf16[96,128], index: 2, kind: input, shape index: {}]   ;;  %s1846_s3 = inlined_call_operand.vmem [shape: f32[2,128], index: 3, kind: input, shape index: {}]   ;;  %s1847_s4 = inlined_call_operand.vmem [shape: f32[2,1], index: 4, kind: output, shape index: {}]  }
   0x1   :  { %s10_s17 = sshll.u32 %s1843_s0, 4  ;;  %s11_s17 = int_to_ptr.vmem [resolvable:$true] %s10_s17 }
   0x2   :  { %13 = dma.vmem_to_smem %s11_s17, 32, %s1573_s18, [#allocation3] }
   0x3   :  { %1567 = dma.done.wait [#allocation3], 32 }
   0x4   :  { %1568 = vsyncadd [#allocation3], 4294967264 }
   0x5   :  { %16 = sfence }
   0x6   :  { %17 = vsyncpa [#allocation6], 0  ;;  %s23_s21 = sshll.u32 %s1844_s1, 4  ;;  %s24_s21 = int_to_ptr.hbm [resolvable:$true] %s23_s21 }
   0x7   :  { %18 = vsyncpa [#allocation8], 0  ;;  %s1574_s22 = smov [#allocation5]   ;;  %s36_s0 = sshll.u32 %s1845_s2, 4  ;;  %s37_s0 = int_to_ptr.hbm [resolvable:$true] %s36_s0 }
   0x8   :  { %s25_s23 = sshll.u32 %s1574_s22, 4  ;;  %s1575_s26 = smov 16   ;;  %s26_s23 = int_to_ptr.vmem [resolvable:$true] %s25_s23 }
   0x9   :  { %s1576_s27 = smov 1   ;;  %s1577_s28 = smov [#allocation7]  }
   0xa   :  { %31 = dma.hbm_to_vmem [thread:$0]  %s24_s21, 800, %s26_s23, [#allocation6], %s1575_s26, %s1575_s26, %s1576_s27  }
   0xb   :  { %s38_s29 = sshll.u32 %s1577_s28, 4  ;;  %s1578_s30 = smov 64   ;;  %s39_s29 = int_to_ptr.vmem [resolvable:$true] %s38_s29 }
   0xc   :  { %s1579_s5 = smov 4  }
   0xd   :  { %44 = dma.hbm_to_vmem [thread:$0]  %s37_s0, 768, %s39_s29, [#allocation8], %s1578_s30, %s1578_s30, %s1579_s5  }
   0xe   :  { %1569 = dma.done.wait [#allocation6], 800  }
   0xf   :  { %1570 = vsyncadd [#allocation6], 4294966496 }
  0x10   :  { %1571 = dma.done.wait [#allocation8], 768  }
  0x11   :  { %1572 = vsyncadd [#allocation8], 4294966528  ;;  %s56_s1 = sld [smem:[#allocation4]]  ;;  %v1619_v0 = vld [vmem:[#allocation7 + $0x8] sm:$0xff]  ;;  %v1622_v2 = vld [vmem:[#allocation7] sm:$0xff]  ;;  %v1580_v4 = vmov 0  }
  0x12   :  { %s1278_s6 = sld [smem:[#allocation4 + $0x80]]  ;;  %157 = vmatpush.bf16.msra.mxu0 %v1619_v0  ;;  %216 = vmatpush.bf16.msra.mxu1 %v1619_v0  ;;  %s1581_s8 = smov 32   ;;  %v1635_v29 = vld [vmem:[#allocation7 + $0x28] sm:$0xff]  ;;  %v1637_v30 = vld [vmem:[#allocation7 + $0x18] sm:$0xff]  ;;  %v1640_v31 = vld [vmem:[#allocation7 + $0x20] sm:$0xff]  ;;  %vm147_vm4 = vcmask 261120  }
  0x13   :  { %306 = vmatpush.bf16.msra.mxu3 %v1635_v29  ;;  %279 = vmatpush.bf16.msra.mxu2 %v1637_v30  ;;  %v1643_v32 = vld [vmem:[#allocation7 + $0x10] sm:$0xff]  ;;  %s1279_s9 = sld [smem:[#allocation4 + $0x1]]  ;;  %v1667_v44 = vld [vmem:[%s1846_s3] ss:$0 sm:$0xff] }
  0x14   :  { %s1280_s10 = sld [smem:[#allocation4 + $0x81]] }
  0x15   :  { %s1281_s15 = sld [smem:[#allocation4 + $0x2]] }
  0x16   :  { %158 = vmatpush.bf16.msra.mxu0 %v1622_v2  ;;  %217 = vmatpush.bf16.msra.mxu1 %v1622_v2  ;;  %s1282_s16 = sld [smem:[#allocation4 + $0x82]] }
  0x17   :  { %s57_s2 = scalar_lea.vmem [#allocation5], %s56_s1  ;;  %307 = vmatpush.bf16.msra.mxu3 %v1640_v31  ;;  %280 = vmatpush.bf16.msra.mxu2 %v1643_v32  ;;  %s1283_s19 = sld [smem:[#allocation4 + $0x3]] }
  0x18   :  { %v58_v1 = vld [vmem:[%s57_s2] sm:$0x1]  ;;  %s61_s7 = scalar_lea.vmem [#allocation5], %s1278_s6  ;;  %s1284_s20 = sld [smem:[#allocation4 + $0x83]] }
  0x19   :  { %59 = vst [vmem:[#allocation2] sm:$0x1] %v58_v1  ;;  %v62_v3 = vld [vmem:[%s61_s7] sm:$0x1]  ;;  %159 = vmatmul.bf16.vlgmr.msra.gmra.mxu0 %v1580_v4  ;;  %s65_s11 = scalar_lea.vmem [#allocation5], %s1279_s9  ;;  %s1285_s23 = sld [smem:[#allocation4 + $0x4]] }
  0x1a   :  { %63 = vst [vmem:[#allocation2 + $0x1] sm:$0x1] %v62_v3  ;;  %365 = vmatpush.bf16.msrb.mxu0 %v1619_v0  ;;  %416 = vmatpush.bf16.msrb.mxu1 %v1637_v30  ;;  %v66_v36 = vld [vmem:[%s65_s11] sm:$0x1]  ;;  %s69_s12 = scalar_lea.vmem [#allocation5], %s1280_s10  ;;  %s1286_s24 = sld [smem:[#allocation4 + $0x84]] }
  0x1b   :  { %437 = vmatpush.bf16.msrb.mxu2 %v1635_v29  ;;  %496 = vmatpush.bf16.msrb.mxu3 %v1619_v0  ;;  %v70_v37 = vld [vmem:[%s69_s12] sm:$0x1]  ;;  %67 = vst [vmem:[#allocation2 + $0x2] sm:$0x1] %v66_v36  ;;  %s73_s17 = scalar_lea.vmem [#allocation5], %s1281_s15  ;;  %s1287_s26 = sld [smem:[#allocation4 + $0x5]] }
  0x1c   :  { %308 = vmatmul.bf16.vlgmr.msra.gmra.mxu3 %v1580_v4  ;;  %71 = vst [vmem:[#allocation2 + $0x3] sm:$0x1] %v70_v37  ;;  %s77_s18 = scalar_lea.vmem [#allocation5], %s1282_s16  ;;  %s1288_s27 = sld [smem:[#allocation4 + $0x85]] }
  0x1d   :  { %s81_s21 = scalar_lea.vmem [#allocation5], %s1283_s19  ;;  %s1289_s5 = sld [smem:[#allocation4 + $0x6]] }
  0x1e   :  { %366 = vmatpush.bf16.msrb.mxu0 %v1622_v2  ;;  %417 = vmatpush.bf16.msrb.mxu1 %v1643_v32  ;;  %s85_s22 = scalar_lea.vmem [#allocation5], %s1284_s20  ;;  %s1290_s1 = sld [smem:[#allocation4 + $0x86]] }
  0x1f   :  { %438 = vmatpush.bf16.msrb.mxu2 %v1640_v31  ;;  %497 = vmatpush.bf16.msrb.mxu3 %v1622_v2  ;;  %s89_s25 = scalar_lea.vmem [#allocation5], %s1285_s23  ;;  %s1291_s7 = sld [smem:[#allocation4 + $0x7]] }
  0x20   :  { %s93_s0 = scalar_lea.vmem [#allocation5], %s1286_s24  ;;  %s1292_s9 = sld [smem:[#allocation4 + $0x87]] }
  0x21   :  { %v134_v5 = vld [vmem:[#allocation2] sm:$0x3]  ;;  %s97_s28 = scalar_lea.vmem [#allocation5], %s1287_s26  ;;  %s1582_s16 = smov 96  }
  0x22   :  { %547 = vmatpush.bf16.msra.mxu0 %v1637_v30  ;;  %s101_s29 = scalar_lea.vmem [#allocation5], %s1288_s27 }
  0x23   :  { %678 = vmatpush.bf16.msra.mxu3 %v1637_v30  ;;  %v202_v41 = vld [vmem:[#allocation2 + $0x2] sm:$0x3]  ;;  %s105_s6 = scalar_lea.vmem [#allocation5], %s1289_s5 }
  0x24   :  { %s109_s2 = scalar_lea.vmem [#allocation5], %s1290_s1 }
  0x25   :  { %s113_s10 = scalar_lea.vmem [#allocation5], %s1291_s7 }
  0x26   :  { %548 = vmatpush.bf16.msra.mxu0 %v1643_v32  ;;  %s117_s11 = scalar_lea.vmem [#allocation5], %s1292_s9 }
  0x27   :  { %679 = vmatpush.bf16.msra.mxu3 %v1643_v32 }
  0x96   :  { %v160_v6 = vpop.f32.mrf.mxu0 }
  0x97   :  { %v164_v7 = vadd.f32 %v160_v6, %v134_v5 }
  0x99   :  { %1374 = vtanh.f32 %v164_v7  ;;  %v1301_v10 = vmul.f32 -1.442695, %v164_v7 }
  0x9b   :  { %1376 = vpow2.f32 %v1301_v10 }
  0x9e   :  { %v162_v8 = vpop.f32.mrf.mxu0 }
  0x9f   :  { %v1375_v9 = vpop.eup %1374  ;;  %v309_v39 = vpop.f32.mrf.mxu3 }
  0xa0   :  { %187 = vrot.lane.b32.xlu0 %v1375_v9, %s1578_s30 }
  0xa1   :  { %v1377_v11 = vpop.eup %1376 }
  0xa2   :  { %v168_v12 = vadd.f32 1.0, %v1377_v11 }
  0xa4   :  { %1378 = vrcp.f32 %v168_v12  ;;  %v180_v18 = vand.u32 2147483648, %v168_v12  ;;  %vm174_vm1 = vweird.f32 %v168_v12  ;;  %v178_v19 = vand.u32 2147483647, %v168_v12 }
  0xa6   :  { %v181_v21 = vor.u32 1.1754944e-38, %v180_v18  ;;  %vm179_vm3 = vcmp.eq.f32.partialorder %v178_v19, 8.507059e+37 }
  0xa7   :  { %v311_v40 = vpop.f32.mrf.mxu3 }
  0xaa   :  { %v1379_v13 = vpop.eup %1378 }
  0xab   :  { %v170_v14 = vmul.f32 %v1379_v13, %v168_v12  ;;  %vm175_vm0 = vweird.f32 %v1379_v13 }
  0xac   :  { %vm176_vm2 = vmor %vm174_vm1, %vm175_vm0 }
  0xad   :  { %v171_v15 = vsub.f32 1.0, %v170_v14 }
  0xaf   :  { %v172_v16 = vmul.f32 %v1379_v13, %v171_v15 }
  0xb1   :  { %v173_v17 = vadd.f32 %v1379_v13, %v172_v16 }
  0xb3   :  { %v177_v20 = vsel %vm176_vm2, %v1379_v13, %v173_v17 }
  0xb4   :  { %v182_v23 = vsel %vm179_vm3, %v181_v21, %v177_v20 }
  0xb5   :  { %v185_v25 = vmul.f32 0.0, %v182_v23 }
 0x112   :  { %v188_v22 = vpop.permute.xlu0 %187 }
 0x113   :  { %v190_v24 = vmul.f32 %v188_v22, %v182_v23 }
 0x115   :  { %192 = vrot.lane.b32.xlu0 %v190_v24, %s1581_s8 }
 0x187   :  { %v193_v26 = vpop.permute.xlu0 %192 }
 0x188   :  { %v1631_v27 = vadd.f32 %v193_v26, %v185_v25 }
 0x18a   :  { %1380 = vtanh.f32 %v1631_v27 }
 0x190   :  { %v1381_v28 = vpop.eup %1380 }
 0x191   :  { %198 = vrot.lane.b32.xlu1 %v1381_v28, %s1578_s30 }
 0x203   :  { %v199_v33 = vpop.permute.xlu1 %198 }
 0x204   :  { %v201_v34 = vmul.f32 %v199_v33, %v182_v23 }
 0x206   :  { %v203_v35 = vpack.c.bf16 %v201_v34, %v201_v34 }
 0x208   :  { %205 = vrot.lane.b32.xlu1 %v203_v35, %s1581_s8 }
 0x27a   :  { %v206_v38 = vpop.permute.xlu1 %205 }
 0x27b   :  { %1302 = vmatmul.msk.bf16.vlgmr.msra.gmra.mxu1 %vm147_vm4, %v206_v38  ;;  %1312 = vmatmul.msk.bf16.vlgmr.msra.gmra.mxu2 %vm147_vm4, %v206_v38  ;;  %v74_v38 = vld [vmem:[%s73_s17] sm:$0x1] }
 0x27c   :  { %568 = vmatpush.bf16.msra.mxu1 %v1635_v29  ;;  %627 = vmatpush.bf16.msra.mxu2 %v1619_v0  ;;  %75 = vst [vmem:[#allocation2 + $0x4] sm:$0x1] %v74_v38 }
 0x280   :  { %569 = vmatpush.bf16.msra.mxu1 %v1640_v31  ;;  %628 = vmatpush.bf16.msra.mxu2 %v1622_v2 }
 0x2f8   :  { %v219_v42 = vpop.f32.mrf.mxu1 }
 0x2f9   :  { %v223_v43 = vadd.f32 %v219_v42, %v202_v41 }
 0x2fb   :  { %1382 = vtanh.f32 %v223_v43  ;;  %v1303_v52 = vmul.f32 -1.442695, %v223_v43 }
 0x2fe   :  { %v282_v45 = vpop.f32.mrf.mxu2 }
 0x2ff   :  { %v287_v46 = vadd.f32 %v1667_v44, %v282_v45 }
 0x300   :  { %v221_v47 = vpop.f32.mrf.mxu1 }
 0x301   :  { %v1383_v48 = vpop.eup %1382  ;;  %v313_v49 = vadd.f32 %v309_v39, %v287_v46  ;;  %v78_v39 = vld [vmem:[%s77_s18] sm:$0x1] }
 0x302   :  { %246 = vrot.lane.b32.xlu2 %v1383_v48, %s1578_s30  ;;  %79 = vst [vmem:[#allocation2 + $0x5] sm:$0x1] %v78_v39 }
 0x303   :  { %1384 = vtanh.f32 %v313_v49  ;;  %v1321_v53 = vmul.f32 -1.442695, %v313_v49 }
 0x304   :  { %1386 = vpow2.f32 %v1303_v52 }
 0x305   :  { %1388 = vpow2.f32 %v1321_v53 }
 0x306   :  { %v284_v50 = vpop.f32.mrf.mxu2 }
 0x309   :  { %v1385_v51 = vpop.eup %1384  ;;  %v351_v42 = vld [vmem:[#allocation2 + $0x4] sm:$0x3] }
 0x30a   :  { %336 = vrot.lane.b32.xlu2 %v1385_v51, %s1578_s30  ;;  %v1387_v54 = vpop.eup %1386 }
 0x30b   :  { %v227_v55 = vadd.f32 1.0, %v1387_v54  ;;  %v1389_v56 = vpop.eup %1388 }
 0x30c   :  { %v317_v57 = vadd.f32 1.0, %v1389_v56 }
 0x30d   :  { %1390 = vrcp.f32 %v227_v55  ;;  %v239_v4 = vand.u32 2147483648, %v227_v55  ;;  %vm233_vm6 = vweird.f32 %v227_v55  ;;  %v237_v5 = vand.u32 2147483647, %v227_v55 }
 0x30e   :  { %1392 = vrcp.f32 %v317_v57  ;;  %v329_v13 = vand.u32 2147483648, %v317_v57  ;;  %vm323_vm10 = vweird.f32 %v317_v57  ;;  %v327_v14 = vand.u32 2147483647, %v317_v57 }
 0x30f   :  { %v240_v8 = vor.u32 1.1754944e-38, %v239_v4  ;;  %vm238_vm8 = vcmp.eq.f32.partialorder %v237_v5, 8.507059e+37 }
 0x310   :  { %v330_v16 = vor.u32 1.1754944e-38, %v329_v13  ;;  %vm328_vm12 = vcmp.eq.f32.partialorder %v327_v14, 8.507059e+37 }
 0x313   :  { %v1391_v58 = vpop.eup %1390 }
 0x314   :  { %v229_v59 = vmul.f32 %v1391_v58, %v227_v55  ;;  %v1393_v61 = vpop.eup %1392  ;;  %vm234_vm5 = vweird.f32 %v1391_v58 }
 0x315   :  { %v319_v63 = vmul.f32 %v1393_v61, %v317_v57  ;;  %vm235_vm7 = vmor %vm233_vm6, %vm234_vm5  ;;  %vm324_vm9 = vweird.f32 %v1393_v61 }
 0x316   :  { %v230_v60 = vsub.f32 1.0, %v229_v59  ;;  %vm325_vm11 = vmor %vm323_vm10, %vm324_vm9 }
 0x317   :  { %v320_v3 = vsub.f32 1.0, %v319_v63 }
 0x318   :  { %v231_v62 = vmul.f32 %v1391_v58, %v230_v60 }
 0x319   :  { %v321_v7 = vmul.f32 %v1393_v61, %v320_v3 }
 0x31a   :  { %v232_v1 = vadd.f32 %v1391_v58, %v231_v62 }
 0x31b   :  { %v322_v12 = vadd.f32 %v1393_v61, %v321_v7 }
 0x31c   :  { %v236_v6 = vsel %vm235_vm7, %v1391_v58, %v232_v1 }
 0x31d   :  { %v241_v10 = vsel %vm238_vm8, %v240_v8, %v236_v6  ;;  %v326_v15 = vsel %vm325_vm11, %v1393_v61, %v322_v12 }
 0x31e   :  { %v331_v17 = vsel %vm328_vm12, %v330_v16, %v326_v15  ;;  %v244_v20 = vmul.f32 %v241_v10, %v1631_v27 }
 0x31f   :  { %v334_v23 = vmul.f32 0.0, %v331_v17 }
 0x35c   :  { %v247_v9 = vpop.permute.xlu2 %246 }
 0x35d   :  { %v249_v11 = vmul.f32 %v247_v9, %v241_v10 }
 0x35f   :  { %251 = vrot.lane.b32.xlu0 %v249_v11, %s1581_s8 }
 0x364   :  { %v337_v18 = vpop.permute.xlu2 %336 }
 0x365   :  { %v339_v19 = vmul.f32 %v337_v18, %v331_v17 }
 0x367   :  { %341 = vrot.lane.b32.xlu1 %v339_v19, %s1581_s8 }
 0x3d1   :  { %v252_v21 = vpop.permute.xlu0 %251 }
 0x3d2   :  { %v1675_v22 = vadd.f32 %v252_v21, %v244_v20 }
 0x3d4   :  { %1394 = vtanh.f32 %v1675_v22 }
 0x3d9   :  { %v342_v24 = vpop.permute.xlu1 %341 }
 0x3da   :  { %v1395_v25 = vpop.eup %1394  ;;  %v1678_v26 = vadd.f32 %v342_v24, %v334_v23 }
 0x3db   :  { %257 = vrot.lane.b32.xlu2 %v1395_v25, %s1578_s30 }
 0x3dc   :  { %1396 = vtanh.f32 %v1678_v26 }
 0x3e2   :  { %v1397_v28 = vpop.eup %1396 }
 0x3e3   :  { %347 = vrot.lane.b32.xlu0 %v1397_v28, %s1578_s30 }
 0x435   :  { %v258_v33 = vpop.permute.xlu2 %257 }
 0x436   :  { %v260_v34 = vmul.f32 %v258_v33, %v241_v10 }
 0x438   :  { %v352_v27 = vpack.c.bf16 %v260_v34, %v260_v34 }
 0x43a   :  { %354 = vrot.lane.b32.xlu1 %v352_v27, %s1581_s8 }
 0x455   :  { %v348_v35 = vpop.permute.xlu0 %347 }
 0x456   :  { %v350_v36 = vmul.f32 %v348_v35, %v331_v17 }
 0x458   :  { %v424_v37 = vpack.c.bf16 %v350_v36, %v350_v36 }
 0x45a   :  { %426 = vrot.lane.b32.xlu2 %v424_v37, %s1581_s8 }
 0x4ac   :  { %v355_v40 = vpop.permute.xlu1 %354 }
 0x4ad   :  { %1322 = vmatmul.msk.bf16.vlgmr.msrb.gmra.mxu0 %vm147_vm4, %v355_v40  ;;  %1324 = vmatmul.msk.bf16.vlgmr.msrb.gmra.mxu1 %vm147_vm4, %v355_v40 }
 0x4ae   :  { %699 = vmatpush.bf16.msrb.mxu0 %v1635_v29  ;;  %758 = vmatpush.bf16.msrb.mxu1 %v1619_v0 }
 0x4b2   :  { %700 = vmatpush.bf16.msrb.mxu0 %v1640_v31  ;;  %759 = vmatpush.bf16.msrb.mxu1 %v1622_v2 }
 0x4b4   :  { %v427_v41 = vpop.permute.xlu2 %426 }
 0x4b5   :  { %1325 = vmatmul.msk.bf16.vlgmr.msrb.gmra.mxu2 %vm147_vm4, %v427_v41 }
 0x4b6   :  { %809 = vmatpush.bf16.msrb.mxu2 %v1637_v30 }
 0x4ba   :  { %810 = vmatpush.bf16.msrb.mxu2 %v1643_v32 }
 0x52a   :  { %v368_v43 = vpop.f32.mrf.mxu0  ;;  %v419_v45 = vpop.f32.mrf.mxu1 }
 0x52b   :  { %v372_v46 = vadd.f32 %v368_v43, %v351_v42  ;;  %v423_v50 = vadd.f32 %v1667_v44, %v419_v45  ;;  %v82_v43 = vld [vmem:[%s81_s21] sm:$0x1] }
 0x52c   :  { %v86_v45 = vld [vmem:[%s85_s22] sm:$0x1]  ;;  %83 = vst [vmem:[#allocation2 + $0x6] sm:$0x1] %v82_v43 }
 0x52d   :  { %1398 = vtanh.f32 %v372_v46  ;;  %v1323_v55 = vmul.f32 -1.442695, %v372_v46  ;;  %87 = vst [vmem:[#allocation2 + $0x7] sm:$0x1] %v86_v45 }
 0x532   :  { %v370_v47 = vpop.f32.mrf.mxu0  ;;  %v421_v48 = vpop.f32.mrf.mxu1 }
 0x533   :  { %v1399_v49 = vpop.eup %1398 }
 0x534   :  { %395 = vrot.lane.b32.xlu0 %v1399_v49, %s1578_s30  ;;  %v482_v47 = vld [vmem:[#allocation2 + $0x6] sm:$0x3] }
 0x538   :  { %v440_v51 = vpop.f32.mrf.mxu2 }
 0x539   :  { %v444_v52 = vadd.f32 %v440_v51, %v423_v50 }
 0x53b   :  { %1400 = vtanh.f32 %v444_v52  ;;  %v1326_v58 = vmul.f32 -1.442695, %v444_v52 }
 0x53c   :  { %1402 = vpow2.f32 %v1323_v55 }
 0x540   :  { %v442_v53 = vpop.f32.mrf.mxu2 }
 0x541   :  { %v1401_v54 = vpop.eup %1400 }
 0x542   :  { %467 = vrot.lane.b32.xlu1 %v1401_v54, %s1578_s30  ;;  %v1403_v56 = vpop.eup %1402 }
 0x543   :  { %v376_v57 = vadd.f32 1.0, %v1403_v56 }
 0x545   :  { %1404 = vrcp.f32 %v376_v57  ;;  %v388_v5 = vand.u32 2147483648, %v376_v57  ;;  %vm382_vm14 = vweird.f32 %v376_v57  ;;  %v386_v6 = vand.u32 2147483647, %v376_v57 }
 0x546   :  { %1406 = vpow2.f32 %v1326_v58 }
 0x547   :  { %v389_v9 = vor.u32 1.1754944e-38, %v388_v5  ;;  %vm387_vm0 = vcmp.eq.f32.partialorder %v386_v6, 8.507059e+37 }
 0x54b   :  { %v1405_v59 = vpop.eup %1404 }
 0x54c   :  { %v1407_v60 = vpop.eup %1406  ;;  %v378_v61 = vmul.f32 %v1405_v59, %v376_v57  ;;  %vm383_vm13 = vweird.f32 %v1405_v59 }
 0x54d   :  { %v448_v62 = vadd.f32 1.0, %v1407_v60  ;;  %vm384_vm15 = vmor %vm382_vm14, %vm383_vm13 }
 0x54e   :  { %v379_v63 = vsub.f32 1.0, %v378_v61 }
 0x54f   :  { %1408 = vrcp.f32 %v448_v62  ;;  %v460_v16 = vand.u32 2147483648, %v448_v62  ;;  %vm454_vm2 = vweird.f32 %v448_v62  ;;  %v458_v17 = vand.u32 2147483647, %v448_v62 }
 0x550   :  { %v380_v1 = vmul.f32 %v1405_v59, %v379_v63 }
 0x551   :  { %v461_v19 = vor.u32 1.1754944e-38, %v460_v16  ;;  %vm459_vm5 = vcmp.eq.f32.partialorder %v458_v17, 8.507059e+37 }
 0x552   :  { %v381_v4 = vadd.f32 %v1405_v59, %v380_v1 }
 0x554   :  { %v385_v8 = vsel %vm384_vm15, %v1405_v59, %v381_v4 }
 0x555   :  { %v1409_v3 = vpop.eup %1408  ;;  %v390_v12 = vsel %vm387_vm0, %v389_v9, %v385_v8 }
 0x556   :  { %v450_v7 = vmul.f32 %v1409_v3, %v448_v62  ;;  %vm455_vm1 = vweird.f32 %v1409_v3  ;;  %v393_v24 = vmul.f32 %v390_v12, %v1675_v22 }
 0x557   :  { %vm456_vm3 = vmor %vm454_vm2, %vm455_vm1 }
 0x558   :  { %v451_v10 = vsub.f32 1.0, %v450_v7 }
 0x55a   :  { %v452_v14 = vmul.f32 %v1409_v3, %v451_v10 }
 0x55c   :  { %v453_v15 = vadd.f32 %v1409_v3, %v452_v14 }
 0x55e   :  { %v457_v18 = vsel %vm456_vm3, %v1409_v3, %v453_v15 }
 0x55f   :  { %v462_v21 = vsel %vm459_vm5, %v461_v19, %v457_v18 }
 0x560   :  { %v465_v34 = vmul.f32 %v462_v21, %v1678_v26 }
 0x5a6   :  { %v396_v11 = vpop.permute.xlu0 %395 }
 0x5a7   :  { %v398_v13 = vmul.f32 %v396_v11, %v390_v12 }
 0x5a9   :  { %400 = vrot.lane.b32.xlu2 %v398_v13, %s1581_s8 }
 0x5b4   :  { %v468_v20 = vpop.permute.xlu1 %467 }
 0x5b5   :  { %v470_v23 = vmul.f32 %v468_v20, %v462_v21 }
 0x5b7   :  { %472 = vrot.lane.b32.xlu0 %v470_v23, %s1581_s8 }
 0x603   :  { %v401_v25 = vpop.permute.xlu2 %400 }
 0x604   :  { %v1700_v28 = vadd.f32 %v401_v25, %v393_v24 }
 0x606   :  { %1410 = vtanh.f32 %v1700_v28 }
 0x60c   :  { %v1411_v33 = vpop.eup %1410 }
 0x60d   :  { %406 = vrot.lane.b32.xlu1 %v1411_v33, %s1578_s30 }
 0x629   :  { %v473_v27 = vpop.permute.xlu0 %472 }
 0x62a   :  { %v1705_v35 = vadd.f32 %v473_v27, %v465_v34 }
 0x62c   :  { %1412 = vtanh.f32 %v1705_v35 }
 0x632   :  { %v1413_v36 = vpop.eup %1412 }
 0x633   :  { %478 = vrot.lane.b32.xlu2 %v1413_v36, %s1578_s30 }
 0x67f   :  { %v407_v37 = vpop.permute.xlu1 %406 }
 0x680   :  { %v409_v22 = vmul.f32 %v407_v37, %v390_v12 }
 0x682   :  { %v483_v38 = vpack.c.bf16 %v409_v22, %v409_v22 }
 0x684   :  { %485 = vrot.lane.b32.xlu0 %v483_v38, %s1581_s8 }
 0x68d   :  { %v479_v39 = vpop.permute.xlu2 %478 }
 0x68e   :  { %v481_v40 = vmul.f32 %v479_v39, %v462_v21 }
 0x690   :  { %v555_v41 = vpack.c.bf16 %v481_v40, %v481_v40 }
 0x692   :  { %557 = vrot.lane.b32.xlu1 %v555_v41, %s1581_s8 }
 0x6f6   :  { %v486_v42 = vpop.permute.xlu0 %485 }
 0x6f7   :  { %1327 = vmatmul.msk.bf16.vlgmr.msrb.gmra.mxu3 %vm147_vm4, %v486_v42  ;;  %1329 = vmatmul.msk.bf16.vlgmr.msra.gmra.mxu0 %vm147_vm4, %v486_v42 }
 0x6f8   :  { %830 = vmatpush.bf16.msrb.mxu3 %v1635_v29  ;;  %889 = vmatpush.bf16.msra.mxu0 %v1619_v0 }
 0x6fc   :  { %831 = vmatpush.bf16.msrb.mxu3 %v1640_v31  ;;  %890 = vmatpush.bf16.msra.mxu0 %v1622_v2 }
 0x704   :  { %v558_v26 = vpop.permute.xlu1 %557 }
 0x705   :  { %1330 = vmatmul.msk.bf16.vlgmr.msra.gmra.mxu1 %vm147_vm4, %v558_v26 }
 0x706   :  { %940 = vmatpush.bf16.msra.mxu1 %v1637_v30 }
 0x70a   :  { %941 = vmatpush.bf16.msra.mxu1 %v1643_v32 }
 0x774   :  { %v550_v46 = vpop.f32.mrf.mxu0 }
 0x775   :  { %v554_v51 = vadd.f32 %v1667_v44, %v550_v46  ;;  %v90_v46 = vld [vmem:[%s89_s25] sm:$0x1] }
 0x776   :  { %91 = vst [vmem:[#allocation2 + $0x8] sm:$0x1] %v90_v46  ;;  %v98_v46 = vld [vmem:[%s97_s28] sm:$0x1] }
 0x777   :  { %99 = vst [vmem:[#allocation2 + $0xa] sm:$0x1] %v98_v46 }
 0x77a   :  { %v499_v48 = vpop.f32.mrf.mxu3 }
 0x77b   :  { %v503_v49 = vadd.f32 %v499_v48, %v482_v47  ;;  %v94_v47 = vld [vmem:[%s93_s0] sm:$0x1] }
 0x77c   :  { %v552_v50 = vpop.f32.mrf.mxu0  ;;  %95 = vst [vmem:[#allocation2 + $0x9] sm:$0x1] %v94_v47  ;;  %v102_v47 = vld [vmem:[%s101_s29] sm:$0x1] }
 0x77d   :  { %1414 = vtanh.f32 %v503_v49  ;;  %v1328_v58 = vmul.f32 -1.442695, %v503_v49  ;;  %103 = vst [vmem:[#allocation2 + $0xb] sm:$0x1] %v102_v47 }
 0x782   :  { %v501_v52 = vpop.f32.mrf.mxu3  ;;  %v571_v53 = vpop.f32.mrf.mxu1 }
 0x783   :  { %v1415_v54 = vpop.eup %1414  ;;  %v575_v55 = vadd.f32 %v571_v53, %v554_v51  ;;  %v613_v49 = vld [vmem:[#allocation2 + $0x8] sm:$0x3] }
 0x784   :  { %526 = vrot.lane.b32.xlu2 %v1415_v54, %s1578_s30 }
 0x785   :  { %1416 = vtanh.f32 %v575_v55  ;;  %v1331_v1 = vmul.f32 -1.442695, %v575_v55 }
 0x786   :  { %1418 = vpow2.f32 %v1328_v58 }
 0x78a   :  { %v573_v56 = vpop.f32.mrf.mxu1 }
 0x78b   :  { %v1417_v57 = vpop.eup %1416 }
 0x78c   :  { %598 = vrot.lane.b32.xlu0 %v1417_v57, %s1578_s30  ;;  %v1419_v59 = vpop.eup %1418 }
 0x78d   :  { %v507_v60 = vadd.f32 1.0, %v1419_v59 }
 0x78f   :  { %1420 = vrcp.f32 %v507_v60  ;;  %v519_v5 = vand.u32 2147483648, %v507_v60  ;;  %vm513_vm7 = vweird.f32 %v507_v60  ;;  %v517_v6 = vand.u32 2147483647, %v507_v60 }
 0x790   :  { %1422 = vpow2.f32 %v1331_v1 }
 0x791   :  { %v520_v9 = vor.u32 1.1754944e-38, %v519_v5  ;;  %vm518_vm9 = vcmp.eq.f32.partialorder %v517_v6, 8.507059e+37 }
 0x795   :  { %v1421_v61 = vpop.eup %1420 }
 0x796   :  { %v509_v62 = vmul.f32 %v1421_v61, %v507_v60  ;;  %vm514_vm6 = vweird.f32 %v1421_v61  ;;  %v1423_v7 = vpop.eup %1422 }
 0x797   :  { %vm515_vm8 = vmor %vm513_vm7, %vm514_vm6  ;;  %v579_v10 = vadd.f32 1.0, %v1423_v7 }
 0x798   :  { %v510_v63 = vsub.f32 1.0, %v509_v62 }
 0x799   :  { %1424 = vrcp.f32 %v579_v10  ;;  %v591_v19 = vand.u32 2147483648, %v579_v10  ;;  %vm585_vm11 = vweird.f32 %v579_v10  ;;  %v589_v20 = vand.u32 2147483647, %v579_v10 }
 0x79a   :  { %v511_v3 = vmul.f32 %v1421_v61, %v510_v63 }
 0x79b   :  { %v592_v23 = vor.u32 1.1754944e-38, %v591_v19  ;;  %vm590_vm13 = vcmp.eq.f32.partialorder %v589_v20, 8.507059e+37 }
 0x79c   :  { %v512_v4 = vadd.f32 %v1421_v61, %v511_v3 }
 0x79e   :  { %v516_v8 = vsel %vm515_vm8, %v1421_v61, %v512_v4 }
 0x79f   :  { %v521_v11 = vsel %vm518_vm9, %v520_v9, %v516_v8  ;;  %v1425_v14 = vpop.eup %1424 }
 0x7a0   :  { %v581_v15 = vmul.f32 %v1425_v14, %v579_v10  ;;  %vm586_vm10 = vweird.f32 %v1425_v14  ;;  %v524_v34 = vmul.f32 %v521_v11, %v1700_v28 }
 0x7a1   :  { %vm587_vm12 = vmor %vm585_vm11, %vm586_vm10 }
 0x7a2   :  { %v582_v16 = vsub.f32 1.0, %v581_v15 }
 0x7a4   :  { %v583_v17 = vmul.f32 %v1425_v14, %v582_v16 }
 0x7a6   :  { %v584_v18 = vadd.f32 %v1425_v14, %v583_v17 }
 0x7a8   :  { %v588_v21 = vsel %vm587_vm12, %v1425_v14, %v584_v18 }
 0x7a9   :  { %v593_v25 = vsel %vm590_vm13, %v592_v23, %v588_v21 }
 0x7aa   :  { %v596_v37 = vmul.f32 %v593_v25, %v1705_v35 }
 0x7de   :  { %v527_v12 = vpop.permute.xlu2 %526 }
 0x7df   :  { %v529_v13 = vmul.f32 %v527_v12, %v521_v11 }
 0x7e1   :  { %531 = vrot.lane.b32.xlu1 %v529_v13, %s1581_s8 }
 0x7fe   :  { %v599_v24 = vpop.permute.xlu0 %598 }
 0x7ff   :  { %v601_v33 = vmul.f32 %v599_v24, %v593_v25 }
 0x801   :  { %603 = vrot.lane.b32.xlu2 %v601_v33, %s1581_s8 }
 0x853   :  { %v532_v27 = vpop.permute.xlu1 %531 }
 0x854   :  { %v1726_v36 = vadd.f32 %v532_v27, %v524_v34 }
 0x856   :  { %1426 = vtanh.f32 %v1726_v36 }
 0x85b   :  { %v604_v22 = vpop.permute.xlu2 %603 }
 0x85c   :  { %v1427_v38 = vpop.eup %1426  ;;  %v1730_v39 = vadd.f32 %v604_v22, %v596_v37 }
 0x85d   :  { %537 = vrot.lane.b32.xlu0 %v1427_v38, %s1578_s30 }
 0x85e   :  { %1428 = vtanh.f32 %v1730_v39 }
 0x864   :  { %v1429_v40 = vpop.eup %1428 }
 0x865   :  { %609 = vrot.lane.b32.xlu1 %v1429_v40, %s1578_s30 }
 0x8cf   :  { %v538_v41 = vpop.permute.xlu0 %537 }
 0x8d0   :  { %v540_v28 = vmul.f32 %v538_v41, %v521_v11 }
 0x8d2   :  { %v614_v42 = vpack.c.bf16 %v540_v28, %v540_v28 }
 0x8d4   :  { %616 = vrot.lane.b32.xlu2 %v614_v42, %s1581_s8 }
 0x8d7   :  { %v610_v26 = vpop.permute.xlu1 %609 }
 0x8d8   :  { %v612_v43 = vmul.f32 %v610_v26, %v593_v25 }
 0x8da   :  { %v686_v45 = vpack.c.bf16 %v612_v43, %v612_v43 }
 0x8dc   :  { %688 = vrot.lane.b32.xlu0 %v686_v45, %s1581_s8 }
 0x92e   :  { %v617_v35 = vpop.permute.xlu2 %616 }
 0x92f   :  { %1332 = vmatmul.msk.bf16.vlgmr.msra.gmra.mxu2 %vm147_vm4, %v617_v35  ;;  %1334 = vmatmul.msk.bf16.vlgmr.msra.gmra.mxu3 %vm147_vm4, %v617_v35 }
 0x930   :  { %961 = vmatpush.bf16.msra.mxu2 %v1635_v29  ;;  %1020 = vmatpush.bf16.msra.mxu3 %v1619_v0 }
 0x934   :  { %962 = vmatpush.bf16.msra.mxu2 %v1640_v31  ;;  %1021 = vmatpush.bf16.msra.mxu3 %v1622_v2 }
 0x94e   :  { %v689_v48 = vpop.permute.xlu0 %688 }
 0x94f   :  { %1335 = vmatmul.msk.bf16.vlgmr.msrb.gmra.mxu0 %vm147_vm4, %v689_v48 }
 0x950   :  { %1071 = vmatpush.bf16.msrb.mxu0 %v1637_v30 }
 0x954   :  { %1072 = vmatpush.bf16.msrb.mxu0 %v1643_v32 }
 0x9b2   :  { %v630_v50 = vpop.f32.mrf.mxu2  ;;  %v681_v51 = vpop.f32.mrf.mxu3 }
 0x9b3   :  { %v634_v52 = vadd.f32 %v630_v50, %v613_v49  ;;  %v685_v55 = vadd.f32 %v1667_v44, %v681_v51  ;;  %v744_v50 = vld [vmem:[#allocation2 + $0xa] sm:$0x3] }
 0x9b5   :  { %1430 = vtanh.f32 %v634_v52  ;;  %v1333_v59 = vmul.f32 -1.442695, %v634_v52 }
 0x9ba   :  { %v632_v53 = vpop.f32.mrf.mxu2  ;;  %v683_v54 = vpop.f32.mrf.mxu3 }
 0x9bb   :  { %v1431_v0 = vpop.eup %1430 }
 0x9bc   :  { %657 = vrot.lane.b32.xlu1 %v1431_v0, %s1578_s30 }
 0x9cc   :  { %v702_v2 = vpop.f32.mrf.mxu0 }
 0x9cd   :  { %v706_v56 = vadd.f32 %v702_v2, %v685_v55 }
 0x9cf   :  { %1432 = vtanh.f32 %v706_v56  ;;  %v1336_v60 = vmul.f32 -1.442695, %v706_v56 }
 0x9d0   :  { %1434 = vpow2.f32 %v1333_v59 }
 0x9d1   :  { %1436 = vpow2.f32 %v1336_v60 }
 0x9d4   :  { %v704_v57 = vpop.f32.mrf.mxu0 }
 0x9d5   :  { %v1433_v58 = vpop.eup %1432 }
 0x9d6   :  { %729 = vrot.lane.b32.xlu2 %v1433_v58, %s1578_s30  ;;  %v1435_v61 = vpop.eup %1434 }
 0x9d7   :  { %v1437_v62 = vpop.eup %1436  ;;  %v638_v63 = vadd.f32 1.0, %v1435_v61 }
 0x9d8   :  { %v710_v1 = vadd.f32 1.0, %v1437_v62 }
 0x9d9   :  { %1438 = vrcp.f32 %v638_v63  ;;  %v650_v12 = vand.u32 2147483648, %v638_v63  ;;  %vm644_vm15 = vweird.f32 %v638_v63  ;;  %v648_v13 = vand.u32 2147483647, %v638_v63 }
 0x9da   :  { %1440 = vrcp.f32 %v710_v1  ;;  %v722_v15 = vand.u32 2147483648, %v710_v1  ;;  %vm716_vm2 = vweird.f32 %v710_v1  ;;  %v720_v17 = vand.u32 2147483647, %v710_v1 }
 0x9db   :  { %v651_v18 = vor.u32 1.1754944e-38, %v650_v12  ;;  %vm649_vm5 = vcmp.eq.f32.partialorder %v648_v13, 8.507059e+37 }
 0x9dc   :  { %v723_v23 = vor.u32 1.1754944e-38, %v722_v15  ;;  %vm721_vm6 = vcmp.eq.f32.partialorder %v720_v17, 8.507059e+37 }
 0x9df   :  { %v1439_v3 = vpop.eup %1438 }
 0x9e0   :  { %v1441_v4 = vpop.eup %1440  ;;  %v640_v5 = vmul.f32 %v1439_v3, %v638_v63  ;;  %vm645_vm14 = vweird.f32 %v1439_v3 }
 0x9e1   :  { %v712_v6 = vmul.f32 %v1441_v4, %v710_v1  ;;  %vm717_vm0 = vweird.f32 %v1441_v4  ;;  %vm646_vm1 = vmor %vm644_vm15, %vm645_vm14 }
 0x9e2   :  { %v641_v7 = vsub.f32 1.0, %v640_v5  ;;  %vm718_vm3 = vmor %vm716_vm2, %vm717_vm0 }
 0x9e3   :  { %v713_v8 = vsub.f32 1.0, %v712_v6 }
 0x9e4   :  { %v642_v9 = vmul.f32 %v1439_v3, %v641_v7 }
 0x9e5   :  { %v714_v10 = vmul.f32 %v1441_v4, %v713_v8 }
 0x9e6   :  { %v643_v11 = vadd.f32 %v1439_v3, %v642_v9 }
 0x9e7   :  { %v715_v14 = vadd.f32 %v1441_v4, %v714_v10 }
 0x9e8   :  { %v647_v16 = vsel %vm646_vm1, %v1439_v3, %v643_v11 }
 0x9e9   :  { %v719_v19 = vsel %vm718_vm3, %v1441_v4, %v715_v14  ;;  %v652_v20 = vsel %vm649_vm5, %v651_v18, %v647_v16 }
 0x9ea   :  { %v724_v33 = vsel %vm721_vm6, %v723_v23, %v719_v19  ;;  %v655_v27 = vmul.f32 %v652_v20, %v1726_v36 }
 0x9eb   :  { %v727_v38 = vmul.f32 %v724_v33, %v1730_v39 }
 0xa2e   :  { %v658_v21 = vpop.permute.xlu1 %657 }
 0xa2f   :  { %v660_v24 = vmul.f32 %v658_v21, %v652_v20 }
 0xa30   :  { %v730_v25 = vpop.permute.xlu2 %729 }
 0xa31   :  { %v732_v34 = vmul.f32 %v730_v25, %v724_v33  ;;  %662 = vrot.lane.b32.xlu0 %v660_v24, %s1581_s8 }
 0xa33   :  { %734 = vrot.lane.b32.xlu1 %v732_v34, %s1581_s8 }
 0xaa3   :  { %v663_v37 = vpop.permute.xlu0 %662 }
 0xaa4   :  { %v1752_v22 = vadd.f32 %v663_v37, %v655_v27 }
 0xaa5   :  { %v735_v40 = vpop.permute.xlu1 %734 }
 0xaa6   :  { %1442 = vtanh.f32 %v1752_v22  ;;  %v1756_v41 = vadd.f32 %v735_v40, %v727_v38 }
 0xaa8   :  { %1444 = vtanh.f32 %v1756_v41 }
 0xaac   :  { %v1443_v28 = vpop.eup %1442 }
 0xaad   :  { %668 = vrot.lane.b32.xlu2 %v1443_v28, %s1578_s30 }
 0xaae   :  { %v1445_v42 = vpop.eup %1444 }
 0xaaf   :  { %740 = vrot.lane.b32.xlu0 %v1445_v42, %s1578_s30 }
 0xb07   :  { %v669_v26 = vpop.permute.xlu2 %668 }
 0xb08   :  { %v671_v36 = vmul.f32 %v669_v26, %v652_v20 }
 0xb0a   :  { %v745_v43 = vpack.c.bf16 %v671_v36, %v671_v36 }
 0xb0c   :  { %747 = vrot.lane.b32.xlu1 %v745_v43, %s1581_s8 }
 0xb21   :  { %v741_v45 = vpop.permute.xlu0 %740 }
 0xb22   :  { %v743_v39 = vmul.f32 %v741_v45, %v724_v33 }
 0xb24   :  { %v817_v35 = vpack.c.bf16 %v743_v39, %v743_v39  ;;  %v110_v39 = vld [vmem:[%s109_s2] sm:$0x1] }
 0xb25   :  { %111 = vst [vmem:[#allocation2 + $0xd] sm:$0x1] %v110_v39 }
 0xb26   :  { %819 = vrot.lane.b32.xlu2 %v817_v35, %s1581_s8 }
 0xb7e   :  { %v748_v48 = vpop.permute.xlu1 %747 }
 0xb7f   :  { %1337 = vmatmul.msk.bf16.vlgmr.msrb.gmra.mxu1 %vm147_vm4, %v748_v48  ;;  %1339 = vmatmul.msk.bf16.vlgmr.msrb.gmra.mxu2 %vm147_vm4, %v748_v48 }
 0xb80   :  { %v820_v49 = vpop.permute.xlu2 %819  ;;  %1092 = vmatpush.bf16.msrb.mxu1 %v1635_v29  ;;  %1150 = vmatpush.bf16.msrb.mxu2 %v1637_v30 }
 0xb81   :  { %1340 = vmatmul.msk.bf16.vlgmr.msrb.gmra.mxu3 %vm147_vm4, %v820_v49 }
 0xb82   :  { %1171 = vmatpush.bf16.msrb.mxu3 %v1635_v29 }
 0xb84   :  { %1093 = vmatpush.bf16.msrb.mxu1 %v1640_v31  ;;  %1151 = vmatpush.bf16.msrb.mxu2 %v1643_v32 }
 0xb86   :  { %1172 = vmatpush.bf16.msrb.mxu3 %v1640_v31 }
 0xbfc   :  { %v761_v51 = vpop.f32.mrf.mxu1 }
 0xbfd   :  { %v765_v52 = vadd.f32 %v761_v51, %v744_v50 }
 0xbff   :  { %1446 = vtanh.f32 %v765_v52  ;;  %v1338_v31 = vmul.f32 -1.442695, %v765_v52 }
 0xc02   :  { %v812_v53 = vpop.f32.mrf.mxu2 }
 0xc03   :  { %v816_v54 = vadd.f32 %v1667_v44, %v812_v53 }
 0xc04   :  { %v763_v0 = vpop.f32.mrf.mxu1  ;;  %v833_v55 = vpop.f32.mrf.mxu3 }
 0xc05   :  { %v1447_v30 = vpop.eup %1446  ;;  %v837_v2 = vadd.f32 %v833_v55, %v816_v54 }
 0xc06   :  { %788 = vrot.lane.b32.xlu0 %v1447_v30, %s1578_s30 }
 0xc07   :  { %1448 = vtanh.f32 %v837_v2  ;;  %v1341_v32 = vmul.f32 -1.442695, %v837_v2 }
 0xc08   :  { %1450 = vpow2.f32 %v1338_v31 }
 0xc09   :  { %1452 = vpow2.f32 %v1341_v32 }
 0xc0a   :  { %v814_v29 = vpop.f32.mrf.mxu2 }
 0xc0c   :  { %v835_v56 = vpop.f32.mrf.mxu3 }
 0xc0d   :  { %v1449_v57 = vpop.eup %1448 }
 0xc0e   :  { %860 = vrot.lane.b32.xlu1 %v1449_v57, %s1578_s30  ;;  %v1451_v58 = vpop.eup %1450 }
 0xc0f   :  { %v769_v59 = vadd.f32 1.0, %v1451_v58  ;;  %v1453_v60 = vpop.eup %1452 }
 0xc10   :  { %v841_v61 = vadd.f32 1.0, %v1453_v60 }
 0xc11   :  { %1454 = vrcp.f32 %v769_v59  ;;  %v781_v8 = vand.u32 2147483648, %v769_v59  ;;  %vm775_vm8 = vweird.f32 %v769_v59  ;;  %v779_v9 = vand.u32 2147483647, %v769_v59 }
 0xc12   :  { %1456 = vrcp.f32 %v841_v61  ;;  %v853_v17 = vand.u32 2147483648, %v841_v61  ;;  %vm847_vm12 = vweird.f32 %v841_v61  ;;  %v851_v18 = vand.u32 2147483647, %v841_v61 }
 0xc13   :  { %v782_v12 = vor.u32 1.1754944e-38, %v781_v8  ;;  %vm780_vm10 = vcmp.eq.f32.partialorder %v779_v9, 8.507059e+37 }
 0xc14   :  { %v854_v20 = vor.u32 1.1754944e-38, %v853_v17  ;;  %vm852_vm14 = vcmp.eq.f32.partialorder %v851_v18, 8.507059e+37 }
 0xc17   :  { %v1455_v62 = vpop.eup %1454 }
 0xc18   :  { %v771_v63 = vmul.f32 %v1455_v62, %v769_v59  ;;  %v1457_v3 = vpop.eup %1456  ;;  %vm776_vm7 = vweird.f32 %v1455_v62 }
 0xc19   :  { %v843_v5 = vmul.f32 %v1457_v3, %v841_v61  ;;  %vm777_vm9 = vmor %vm775_vm8, %vm776_vm7  ;;  %vm848_vm11 = vweird.f32 %v1457_v3 }
 0xc1a   :  { %v772_v1 = vsub.f32 1.0, %v771_v63  ;;  %vm849_vm13 = vmor %vm847_vm12, %vm848_vm11 }
 0xc1b   :  { %v844_v7 = vsub.f32 1.0, %v843_v5 }
 0xc1c   :  { %v773_v4 = vmul.f32 %v1455_v62, %v772_v1 }
 0xc1d   :  { %v845_v11 = vmul.f32 %v1457_v3, %v844_v7 }
 0xc1e   :  { %v774_v6 = vadd.f32 %v1455_v62, %v773_v4 }
 0xc1f   :  { %v846_v16 = vadd.f32 %v1457_v3, %v845_v11 }
 0xc20   :  { %v778_v10 = vsel %vm777_vm9, %v1455_v62, %v774_v6 }
 0xc21   :  { %v783_v14 = vsel %vm780_vm10, %v782_v12, %v778_v10  ;;  %v850_v19 = vsel %vm849_vm13, %v1457_v3, %v846_v16 }
 0xc22   :  { %v855_v23 = vsel %vm852_vm14, %v854_v20, %v850_v19  ;;  %v786_v25 = vmul.f32 %v783_v14, %v1752_v22 }
 0xc23   :  { %v858_v37 = vmul.f32 %v855_v23, %v1756_v41  ;;  %v106_v41 = vld [vmem:[%s105_s6] sm:$0x1] }
 0xc24   :  { %107 = vst [vmem:[#allocation2 + $0xc] sm:$0x1] %v106_v41 }
 0xc2b   :  { %v875_v47 = vld [vmem:[#allocation2 + $0xc] sm:$0x3] }
 0xc78   :  { %v789_v13 = vpop.permute.xlu0 %788 }
 0xc79   :  { %v791_v15 = vmul.f32 %v789_v13, %v783_v14 }
 0xc7b   :  { %793 = vrot.lane.b32.xlu2 %v791_v15, %s1581_s8 }
 0xc80   :  { %v861_v21 = vpop.permute.xlu1 %860 }
 0xc81   :  { %v863_v24 = vmul.f32 %v861_v21, %v855_v23 }
 0xc83   :  { %865 = vrot.lane.b32.xlu0 %v863_v24, %s1581_s8 }
 0xcd5   :  { %v794_v33 = vpop.permute.xlu2 %793 }
 0xcd6   :  { %v1778_v34 = vadd.f32 %v794_v33, %v786_v25 }
 0xcd8   :  { %1458 = vtanh.f32 %v1778_v34 }
 0xcde   :  { %v1459_v27 = vpop.eup %1458 }
 0xcdf   :  { %799 = vrot.lane.b32.xlu1 %v1459_v27, %s1578_s30 }
 0xcf5   :  { %v866_v38 = vpop.permute.xlu0 %865 }
 0xcf6   :  { %v1783_v40 = vadd.f32 %v866_v38, %v858_v37 }
 0xcf8   :  { %1460 = vtanh.f32 %v1783_v40 }
 0xcfe   :  { %v1461_v28 = vpop.eup %1460 }
 0xcff   :  { %871 = vrot.lane.b32.xlu2 %v1461_v28, %s1578_s30 }
 0xd51   :  { %v800_v42 = vpop.permute.xlu1 %799 }
 0xd52   :  { %v802_v22 = vmul.f32 %v800_v42, %v783_v14 }
 0xd54   :  { %v876_v26 = vpack.c.bf16 %v802_v22, %v802_v22 }
 0xd56   :  { %878 = vrot.lane.b32.xlu0 %v876_v26, %s1581_s8 }
 0xd59   :  { %v872_v36 = vpop.permute.xlu2 %871 }
 0xd5a   :  { %v874_v43 = vmul.f32 %v872_v36, %v855_v23 }
 0xd5c   :  { %v948_v45 = vpack.c.bf16 %v874_v43, %v874_v43  ;;  %v114_v43 = vld [vmem:[%s113_s10] sm:$0x1] }
 0xd5d   :  { %115 = vst [vmem:[#allocation2 + $0xe] sm:$0x1] %v114_v43 }
 0xd5e   :  { %950 = vrot.lane.b32.xlu1 %v948_v45, %s1581_s8  ;;  %v118_v45 = vld [vmem:[%s117_s11] sm:$0x1] }
 0xd5f   :  { %119 = vst [vmem:[#allocation2 + $0xf] sm:$0x1] %v118_v45 }
 0xd66   :  { %v1006_v39 = vld [vmem:[#allocation2 + $0xe] sm:$0x3] }
 0xdc8   :  { %v879_v35 = vpop.permute.xlu0 %878 }
 0xdc9   :  { %1342 = vmatmul.msk.bf16.vlgmr.msra.gmra.mxu0 %vm147_vm4, %v879_v35  ;;  %1344 = vmatmul.msk.bf16.vlgmr.msra.gmra.mxu1 %vm147_vm4, %v879_v35 }
 0xdd0   :  { %v951_v46 = vpop.permute.xlu1 %950 }
 0xdd1   :  { %1345 = vmatmul.msk.bf16.vlgmr.msra.gmra.mxu2 %vm147_vm4, %v951_v46 }
 0xe46   :  { %v892_v48 = vpop.f32.mrf.mxu0  ;;  %v943_v49 = vpop.f32.mrf.mxu1 }
 0xe47   :  { %v896_v50 = vadd.f32 %v892_v48, %v875_v47  ;;  %v947_v54 = vadd.f32 %v1667_v44, %v943_v49 }
 0xe49   :  { %1462 = vtanh.f32 %v896_v50  ;;  %v1343_v29 = vmul.f32 -1.442695, %v896_v50  ;;  %v1816_v50 = vld [vmem:[%s1846_s3] ss:$0 sm:$0xff] }
 0xe4e   :  { %v894_v51 = vpop.f32.mrf.mxu0  ;;  %v945_v52 = vpop.f32.mrf.mxu1 }
 0xe4f   :  { %v1463_v53 = vpop.eup %1462 }
 0xe50   :  { %919 = vrot.lane.b32.xlu2 %v1463_v53, %s1578_s30 }
 0xe54   :  { %v964_v0 = vpop.f32.mrf.mxu2 }
 0xe55   :  { %v968_v55 = vadd.f32 %v964_v0, %v947_v54 }
 0xe57   :  { %1464 = vtanh.f32 %v968_v55  ;;  %v1346_v60 = vmul.f32 -1.442695, %v968_v55 }
 0xe58   :  { %1466 = vpow2.f32 %v1343_v29 }
 0xe5c   :  { %v966_v30 = vpop.f32.mrf.mxu2 }
 0xe5d   :  { %v1465_v2 = vpop.eup %1464 }
 0xe5e   :  { %991 = vrot.lane.b32.xlu0 %v1465_v2, %s1578_s30  ;;  %v1467_v56 = vpop.eup %1466 }
 0xe5f   :  { %v900_v57 = vadd.f32 1.0, %v1467_v56 }
 0xe61   :  { %1468 = vrcp.f32 %v900_v57  ;;  %v912_v44 = vand.u32 2147483648, %v900_v57  ;;  %vm906_vm0 = vweird.f32 %v900_v57  ;;  %v910_v62 = vand.u32 2147483647, %v900_v57 }
 0xe62   :  { %1470 = vpow2.f32 %v1346_v60 }
 0xe63   :  { %v913_v1 = vor.u32 1.1754944e-38, %v912_v44  ;;  %vm911_vm2 = vcmp.eq.f32.partialorder %v910_v62, 8.507059e+37 }
 0xe67   :  { %v1469_v31 = vpop.eup %1468 }
 0xe68   :  { %v902_v32 = vmul.f32 %v1469_v31, %v900_v57  ;;  %vm907_vm15 = vweird.f32 %v1469_v31  ;;  %v1471_v6 = vpop.eup %1470 }
 0xe69   :  { %vm908_vm1 = vmor %vm906_vm0, %vm907_vm15  ;;  %v972_v7 = vadd.f32 1.0, %v1471_v6 }
 0xe6a   :  { %v903_v58 = vsub.f32 1.0, %v902_v32 }
 0xe6b   :  { %1472 = vrcp.f32 %v972_v7  ;;  %v984_v13 = vand.u32 2147483648, %v972_v7  ;;  %vm978_vm5 = vweird.f32 %v972_v7  ;;  %v982_v14 = vand.u32 2147483647, %v972_v7 }
 0xe6c   :  { %v904_v59 = vmul.f32 %v1469_v31, %v903_v58 }
 0xe6d   :  { %v985_v16 = vor.u32 1.1754944e-38, %v984_v13  ;;  %vm983_vm7 = vcmp.eq.f32.partialorder %v982_v14, 8.507059e+37 }
 0xe6e   :  { %v905_v61 = vadd.f32 %v1469_v31, %v904_v59 }
 0xe70   :  { %v909_v63 = vsel %vm908_vm1, %v1469_v31, %v905_v61 }
 0xe71   :  { %v914_v4 = vsel %vm911_vm2, %v913_v1, %v909_v63  ;;  %v1473_v8 = vpop.eup %1472 }
 0xe72   :  { %v974_v9 = vmul.f32 %v1473_v8, %v972_v7  ;;  %vm979_vm3 = vweird.f32 %v1473_v8  ;;  %v917_v20 = vmul.f32 %v914_v4, %v1778_v34 }
 0xe73   :  { %vm980_vm6 = vmor %vm978_vm5, %vm979_vm3  ;;  %vm1226_vm3 = vcmask 254976  }
 0xe74   :  { %v975_v10 = vsub.f32 1.0, %v974_v9 }
 0xe76   :  { %v976_v11 = vmul.f32 %v1473_v8, %v975_v10 }
 0xe78   :  { %v977_v12 = vadd.f32 %v1473_v8, %v976_v11 }
 0xe7a   :  { %v981_v15 = vsel %vm980_vm6, %v1473_v8, %v977_v12 }
 0xe7b   :  { %v986_v18 = vsel %vm983_vm7, %v985_v16, %v981_v15 }
 0xe7c   :  { %v989_v25 = vmul.f32 %v986_v18, %v1783_v40 }
 0xeaa   :  { %v920_v3 = vpop.permute.xlu2 %919 }
 0xeab   :  { %v922_v5 = vmul.f32 %v920_v3, %v914_v4 }
 0xead   :  { %924 = vrot.lane.b32.xlu1 %v922_v5, %s1581_s8 }
 0xed0   :  { %v992_v17 = vpop.permute.xlu0 %991 }
 0xed1   :  { %v994_v19 = vmul.f32 %v992_v17, %v986_v18 }
 0xed3   :  { %996 = vrot.lane.b32.xlu2 %v994_v19, %s1581_s8 }
 0xf1f   :  { %v925_v21 = vpop.permute.xlu1 %924 }
 0xf20   :  { %v1798_v23 = vadd.f32 %v925_v21, %v917_v20 }
 0xf22   :  { %1474 = vtanh.f32 %v1798_v23 }
 0xf28   :  { %v1475_v24 = vpop.eup %1474 }
 0xf29   :  { %930 = vrot.lane.b32.xlu0 %v1475_v24, %s1578_s30 }
 0xf2d   :  { %v997_v33 = vpop.permute.xlu2 %996 }
 0xf2e   :  { %v1803_v27 = vadd.f32 %v997_v33, %v989_v25 }
 0xf30   :  { %1476 = vtanh.f32 %v1803_v27 }
 0xf36   :  { %v1477_v37 = vpop.eup %1476 }
 0xf37   :  { %1002 = vrot.lane.b32.xlu1 %v1477_v37, %s1578_s30 }
 0xf9b   :  { %v931_v38 = vpop.permute.xlu0 %930 }
 0xf9c   :  { %v933_v34 = vmul.f32 %v931_v38, %v914_v4 }
 0xf9e   :  { %v1007_v28 = vpack.c.bf16 %v933_v34, %v933_v34 }
 0xfa0   :  { %1009 = vrot.lane.b32.xlu2 %v1007_v28, %s1581_s8 }
 0xfa9   :  { %v1003_v42 = vpop.permute.xlu1 %1002 }
 0xfaa   :  { %v1005_v22 = vmul.f32 %v1003_v42, %v986_v18 }
 0xfac   :  { %v1079_v26 = vpack.c.bf16 %v1005_v22, %v1005_v22 }
 0xfae   :  { %1081 = vrot.lane.b32.xlu0 %v1079_v26, %s1581_s8 }
 0xffa   :  { %v1010_v36 = vpop.permute.xlu2 %1009 }
 0xffb   :  { %1347 = vmatmul.msk.bf16.vlgmr.msra.gmra.mxu3 %vm147_vm4, %v1010_v36  ;;  %1349 = vmatmul.msk.bf16.vlgmr.msrb.gmra.mxu0 %vm147_vm4, %v1010_v36 }
0x1020   :  { %v1082_v40 = vpop.permute.xlu0 %1081 }
0x1021   :  { %1350 = vmatmul.msk.bf16.vlgmr.msrb.gmra.mxu1 %vm147_vm4, %v1082_v40 }
0x1078   :  { %v1074_v41 = vpop.f32.mrf.mxu0 }
0x1079   :  { %v1078_v51 = vadd.f32 %v1816_v50, %v1074_v41 }
0x107e   :  { %v1023_v35 = vpop.f32.mrf.mxu3 }
0x107f   :  { %v1027_v46 = vadd.f32 %v1023_v35, %v1006_v39 }
0x1080   :  { %v1076_v47 = vpop.f32.mrf.mxu0 }
0x1081   :  { %1478 = vtanh.f32 %v1027_v46  ;;  %v1348_v55 = vmul.f32 -1.442695, %v1027_v46 }
0x1086   :  { %v1025_v48 = vpop.f32.mrf.mxu3 }
0x1087   :  { %v1479_v49 = vpop.eup %1478  ;;  %v1373_v48 = vld [vmem:[%s1846_s3 + $0x1] ss:$0 sm:$0xff] }
0x1088   :  { %1050 = vrot.lane.b32.xlu1 %v1479_v49, %s1578_s30 }
0x109e   :  { %v1095_v52 = vpop.f32.mrf.mxu1 }
0x109f   :  { %v1099_v53 = vadd.f32 %v1095_v52, %v1078_v51 }
0x10a1   :  { %1480 = vtanh.f32 %v1099_v53  ;;  %v1351_v30 = vmul.f32 -1.442695, %v1099_v53 }
0x10a2   :  { %1482 = vpow2.f32 %v1348_v55 }
0x10a3   :  { %1484 = vpow2.f32 %v1351_v30 }
0x10a6   :  { %v1097_v54 = vpop.f32.mrf.mxu1 }
0x10a7   :  { %v1481_v0 = vpop.eup %1480 }
0x10a8   :  { %1122 = vrot.lane.b32.xlu2 %v1481_v0, %s1578_s30  ;;  %v1483_v2 = vpop.eup %1482 }
0x10a9   :  { %v1031_v29 = vadd.f32 1.0, %v1483_v2  ;;  %v1485_v56 = vpop.eup %1484 }
0x10aa   :  { %v1103_v57 = vadd.f32 1.0, %v1485_v56 }
0x10ab   :  { %1486 = vrcp.f32 %v1031_v29  ;;  %v1043_v63 = vand.u32 2147483648, %v1031_v29  ;;  %vm1037_vm9 = vweird.f32 %v1031_v29  ;;  %v1041_v1 = vand.u32 2147483647, %v1031_v29 }
0x10ac   :  { %1488 = vrcp.f32 %v1103_v57  ;;  %v1115_v10 = vand.u32 2147483648, %v1103_v57  ;;  %vm1109_vm13 = vweird.f32 %v1103_v57  ;;  %v1113_v11 = vand.u32 2147483647, %v1103_v57 }
0x10ad   :  { %v1044_v5 = vor.u32 1.1754944e-38, %v1043_v63  ;;  %vm1042_vm11 = vcmp.eq.f32.partialorder %v1041_v1, 8.507059e+37 }
0x10ae   :  { %v1116_v13 = vor.u32 1.1754944e-38, %v1115_v10  ;;  %vm1114_vm15 = vcmp.eq.f32.partialorder %v1113_v11, 8.507059e+37 }
0x10b1   :  { %v1487_v31 = vpop.eup %1486 }
0x10b2   :  { %v1033_v32 = vmul.f32 %v1487_v31, %v1031_v29  ;;  %v1489_v59 = vpop.eup %1488  ;;  %vm1038_vm8 = vweird.f32 %v1487_v31 }
0x10b3   :  { %v1105_v61 = vmul.f32 %v1489_v59, %v1103_v57  ;;  %vm1039_vm10 = vmor %vm1037_vm9, %vm1038_vm8  ;;  %vm1110_vm12 = vweird.f32 %v1489_v59  ;;  %vm1254_vm9 = vcmask 1024  }
0x10b4   :  { %v1034_v58 = vsub.f32 1.0, %v1033_v32  ;;  %vm1111_vm14 = vmor %vm1109_vm13, %vm1110_vm12 }
0x10b5   :  { %v1106_v62 = vsub.f32 1.0, %v1105_v61 }
0x10b6   :  { %v1035_v60 = vmul.f32 %v1487_v31, %v1034_v58 }
0x10b7   :  { %v1107_v4 = vmul.f32 %v1489_v59, %v1106_v62 }
0x10b8   :  { %v1036_v44 = vadd.f32 %v1487_v31, %v1035_v60 }
0x10b9   :  { %v1108_v9 = vadd.f32 %v1489_v59, %v1107_v4 }
0x10ba   :  { %v1040_v3 = vsel %vm1039_vm10, %v1487_v31, %v1036_v44 }
0x10bb   :  { %v1045_v6 = vsel %vm1042_vm11, %v1044_v5, %v1040_v3  ;;  %v1112_v12 = vsel %vm1111_vm14, %v1489_v59, %v1108_v9 }
0x10bc   :  { %v1117_v15 = vsel %vm1114_vm15, %v1116_v13, %v1112_v12  ;;  %v1048_v17 = vmul.f32 %v1045_v6, %v1798_v23 }
0x10bd   :  { %v1120_v20 = vmul.f32 %v1117_v15, %v1803_v27 }
0x10fa   :  { %v1051_v7 = vpop.permute.xlu1 %1050 }
0x10fb   :  { %v1053_v8 = vmul.f32 %v1051_v7, %v1045_v6 }
0x10fd   :  { %1055 = vrot.lane.b32.xlu0 %v1053_v8, %s1581_s8 }
0x1102   :  { %v1123_v14 = vpop.permute.xlu2 %1122 }
0x1103   :  { %v1125_v16 = vmul.f32 %v1123_v14, %v1117_v15 }
0x1105   :  { %1127 = vrot.lane.b32.xlu1 %v1125_v16, %s1581_s8 }
0x116f   :  { %v1056_v18 = vpop.permute.xlu0 %1055 }
0x1170   :  { %v1058_v19 = vadd.f32 %v1056_v18, %v1048_v17 }
0x1172   :  { %1490 = vtanh.f32 %v1058_v19 }
0x1177   :  { %v1128_v21 = vpop.permute.xlu1 %1127 }
0x1178   :  { %v1491_v24 = vpop.eup %1490  ;;  %v1130_v25 = vadd.f32 %v1128_v21, %v1120_v20 }
0x1179   :  { %1061 = vrot.lane.b32.xlu2 %v1491_v24, %s1578_s30 }
0x117a   :  { %1492 = vtanh.f32 %v1130_v25 }
0x1180   :  { %v1493_v33 = vpop.eup %1492 }
0x1181   :  { %1133 = vrot.lane.b32.xlu0 %v1493_v33, %s1578_s30 }
0x11d3   :  { %v1062_v37 = vpop.permute.xlu2 %1061 }
0x11d4   :  { %v1064_v38 = vmul.f32 %v1062_v37, %v1045_v6 }
0x11d6   :  { %v1137_v34 = vpack.c.bf16 %v1064_v38, %v1064_v38 }
0x11d8   :  { %1139 = vrot.lane.b32.xlu1 %v1137_v34, %s1581_s8 }
0x11f3   :  { %v1134_v23 = vpop.permute.xlu0 %1133 }
0x11f4   :  { %v1136_v28 = vmul.f32 %v1134_v23, %v1117_v15 }
0x11f6   :  { %v1158_v42 = vpack.c.bf16 %v1136_v28, %v1136_v28 }
0x11f8   :  { %1160 = vrot.lane.b32.xlu2 %v1158_v42, %s1581_s8 }
0x124a   :  { %v1140_v27 = vpop.permute.xlu1 %1139 }
0x124b   :  { %1352 = vmatmul.msk.bf16.vlgmr.msrb.gmra.mxu2 %vm147_vm4, %v1140_v27 }
0x1252   :  { %v1161_v22 = vpop.permute.xlu2 %1160 }
0x1253   :  { %1353 = vmatmul.msk.bf16.vlgmr.msrb.gmra.mxu3 %vm147_vm4, %v1161_v22 }
0x12ce   :  { %v1153_v26 = vpop.f32.mrf.mxu2 }
0x12cf   :  { %v1157_v36 = vadd.f32 %v1816_v50, %v1153_v26 }
0x12d6   :  { %v1155_v40 = vpop.f32.mrf.mxu2  ;;  %v1174_v43 = vpop.f32.mrf.mxu3 }
0x12d7   :  { %v1178_v45 = vadd.f32 %v1174_v43, %v1157_v36 }
0x12d9   :  { %1494 = vtanh.f32 %v1178_v45  ;;  %v1354_v35 = vmul.f32 -1.442695, %v1178_v45 }
0x12db   :  { %1496 = vpow2.f32 %v1354_v35 }
0x12de   :  { %v1176_v41 = vpop.f32.mrf.mxu3 }
0x12df   :  { %v1495_v39 = vpop.eup %1494 }
0x12e0   :  { %1201 = vrot.lane.b32.xlu0 %v1495_v39, %s1578_s30 }
0x12e1   :  { %v1497_v46 = vpop.eup %1496 }
0x12e2   :  { %v1182_v47 = vadd.f32 1.0, %v1497_v46 }
0x12e4   :  { %1498 = vrcp.f32 %v1182_v47  ;;  %v1194_v54 = vand.u32 2147483648, %v1182_v47  ;;  %vm1188_vm0 = vweird.f32 %v1182_v47  ;;  %v1192_v0 = vand.u32 2147483647, %v1182_v47 }
0x12e6   :  { %v1195_v30 = vor.u32 1.1754944e-38, %v1194_v54  ;;  %vm1193_vm2 = vcmp.eq.f32.partialorder %v1192_v0, 8.507059e+37 }
0x12e8   :  { %1218 = vrot.lane.b32.xlu0 %v1373_v48, %s1582_s16 }
0x12ea   :  { %v1499_v49 = vpop.eup %1498 }
0x12eb   :  { %v1184_v50 = vmul.f32 %v1499_v49, %v1182_v47  ;;  %vm1189_vm4 = vweird.f32 %v1499_v49 }
0x12ec   :  { %vm1190_vm1 = vmor %vm1188_vm0, %vm1189_vm4 }
0x12ed   :  { %v1185_v51 = vsub.f32 1.0, %v1184_v50 }
0x12ef   :  { %v1186_v52 = vmul.f32 %v1499_v49, %v1185_v51 }
0x12f1   :  { %v1187_v53 = vadd.f32 %v1499_v49, %v1186_v52 }
0x12f3   :  { %v1191_v55 = vsel %vm1190_vm1, %v1499_v49, %v1187_v53 }
0x12f4   :  { %v1196_v29 = vsel %vm1193_vm2, %v1195_v30, %v1191_v55 }
0x12f5   :  { %v1199_v57 = vmul.f32 %v1196_v29, %v1130_v25 }
0x1352   :  { %v1202_v2 = vpop.permute.xlu0 %1201 }
0x1353   :  { %v1204_v56 = vmul.f32 %v1202_v2, %v1196_v29 }
0x1355   :  { %1206 = vrot.lane.b32.xlu1 %v1204_v56, %s1581_s8 }
0x135a   :  { %v1219_v60 = vpop.permute.xlu0 %1218 }
0x13c7   :  { %v1207_v31 = vpop.permute.xlu1 %1206 }
0x13c8   :  { %v1209_v32 = vadd.f32 %v1207_v31, %v1199_v57 }
0x13ca   :  { %1500 = vtanh.f32 %v1209_v32 }
0x13d0   :  { %v1501_v58 = vpop.eup %1500 }
0x13d1   :  { %1212 = vrot.lane.b32.xlu2 %v1501_v58, %s1578_s30 }
0x142b   :  { %v1213_v59 = vpop.permute.xlu2 %1212 }
0x142c   :  { %v1215_v61 = vmul.f32 %v1213_v59, %v1196_v29 }
0x142e   :  { %v1221_v44 = vmul.f32 %v1219_v60, %v1215_v61 }
0x1430   :  { %1223 = vrot.lane.b32.xlu1 %v1221_v44, %s1581_s8 }
0x14a2   :  { %v1224_v62 = vpop.permute.xlu1 %1223 }
0x14a3   :  { %v1227_v63 = vsel %vm1226_vm3, %v1224_v62, 0.0 }
0x14a4   :  { %1228 = vadd.xlane.f32.xlu2 %v1227_v63 }
0x1517   :  { %v1229_v1 = vpop.xlane.xlu2 %1228 }
0x1518   :  { %v1230_v3 = vadd.f32 %v1373_v48, %v1229_v1 }
0x151a   :  { %v1355_v4 = vmul.f32 -1.442695, %v1230_v3 }
0x151c   :  { %1502 = vpow2.f32 %v1355_v4 }
0x1522   :  { %v1503_v5 = vpop.eup %1502 }
0x1523   :  { %v1234_v6 = vadd.f32 1.0, %v1503_v5 }
0x1525   :  { %1504 = vrcp.f32 %v1234_v6  ;;  %v1246_v10 = vand.u32 2147483648, %v1234_v6  ;;  %v1244_v12 = vand.u32 2147483647, %v1234_v6  ;;  %vm1240_vm6 = vweird.f32 %v1234_v6 }
0x1527   :  { %v1247_v14 = vor.u32 1.1754944e-38, %v1246_v10  ;;  %vm1245_vm8 = vcmp.eq.f32.partialorder %v1244_v12, 8.507059e+37 }
0x152b   :  { %v1505_v7 = vpop.eup %1504 }
0x152c   :  { %v1236_v8 = vmul.f32 %v1505_v7, %v1234_v6  ;;  %vm1241_vm5 = vweird.f32 %v1505_v7 }
0x152d   :  { %vm1242_vm7 = vmor %vm1240_vm6, %vm1241_vm5 }
0x152e   :  { %v1237_v9 = vsub.f32 1.0, %v1236_v8 }
0x1530   :  { %v1238_v11 = vmul.f32 %v1505_v7, %v1237_v9 }
0x1532   :  { %v1239_v13 = vadd.f32 %v1505_v7, %v1238_v11 }
0x1534   :  { %v1243_v15 = vsel %vm1242_vm7, %v1505_v7, %v1239_v13 }
0x1535   :  { %v1248_v16 = vsel %vm1245_vm8, %v1247_v14, %v1243_v15 }
0x1536   :  { %1251 = vrot.lane.b32.xlu0 %v1248_v16, %s1582_s16 }
0x15a8   :  { %v1252_v17 = vpop.permute.xlu0 %1251 }
0x15a9   :  { %1255 = vst.msk [vmem:[%s1847_s4] sm:$0x3] %vm1254_vm9, %v1252_v17 }
0x15aa   :  { %1260 = vsyncpa [#allocation6], 1 }
0x15ab   :  { %1261 = vsyncpa [#allocation8], 1 }

</bundles_post_ra>
